<compile_context>
chip_gen: v7x
topology: tpu7x:2x2x1
jax: 0.10.0
libtpu: 0.0.40
codegen_flags: <defaults>
</compile_context>

<pallas_src>
import math
from functools import partial

import jax
import jax.numpy as jnp
from jax.experimental import pallas as pl
from jax.experimental.pallas import tpu as pltpu

NUM_GROUPS = 32          # DEFAULT_NORMALIZER default
EPS = 1e-6               # DEFAULT_NORMALIZER default


# ------------------------------ generation-aware knobs -------------------------------
def _vmem_limit_bytes():
    cap = None
    try:
        cap = getattr(pltpu.get_tpu_info(), "vmem_capacity_bytes", None)
    except Exception:
        cap = None
    if cap is None:
        try:
            kind = jax.devices()[0].device_kind.lower()
        except Exception:
            kind = ""
        cap = 64 * 1024 * 1024 if "v7" in kind else 128 * 1024 * 1024
    # never request more than ~75% of physical per-core VMEM
    return int(min(100 * 1024 * 1024, cap * 3 // 4))


def _use_bf16_exp():
    # bf16 EUP path exists on v6e / v7x; keep f32 exp elsewhere (v5e has no bf16 EUP).
    try:
        kind = jax.devices()[0].device_kind.lower()
    except Exception:
        return False
    return ("v6" in kind) or ("v7" in kind)


# --------------------- fused kernel (one batch element per grid step) ----------------
def _fused_attn_block_kernel(
        x_ref, gsum_ref, gbc_ref, gamma_ref, beta_ref,
        wqkv_ref, bqkv_ref, wp_ref, bp_ref, out_ref,
        *, num_heads, head_dim, n_valid, bf16_exp):
    x = x_ref[0].astype(jnp.float32)                       # (C, Np) channel-first
    C, Np = x.shape
    padded = n_valid < Np
    d = head_dim
    hid = num_heads * head_dim

    # ---- GroupNorm: reduce over N first (VPU), then tiny (G,C)/(C,G) matmuls --------
    row_sum = jnp.sum(x, axis=-1, keepdims=True)                              # (C, 1)
    mean = jnp.dot(gbc_ref[...],
                   jnp.dot(gsum_ref[...], row_sum,
                           preferred_element_type=jnp.float32),
                   preferred_element_type=jnp.float32)                        # (C, 1)
    xc = x - mean
    if padded:                                      # zero padded lanes before variance
        col = jax.lax.broadcasted_iota(jnp.int32, (1, Np), 1)
        xc = jnp.where(col < n_valid, xc, 0.0)
    row_sq = jnp.sum(xc * xc, axis=-1, keepdims=True)                         # (C, 1)
    var = jnp.dot(gbc_ref[...],
                  jnp.dot(gsum_ref[...], row_sq,
                          preferred_element_type=jnp.float32),
                  preferred_element_type=jnp.float32)                         # (C, 1)
    scale_c = jax.lax.rsqrt(var + EPS) * gamma_ref[...]     # gamma folded into rsqrt
    xn_b = (xc * scale_c + beta_ref[...]).astype(jnp.bfloat16)

    # ---- fused QKV projection: (C,Np)^T . (C,3hid) -> (Np,3hid), bf16 MXU/f32 acc ---
    qkv = jax.lax.dot_general(xn_b, wqkv_ref[...], (((0,), (0,)), ((), ())),
                              preferred_element_type=jnp.float32) + bqkv_ref[...]
    q = qkv[:, :hid].astype(jnp.bfloat16)        # 1/sqrt(d) pre-folded into Wq/bq
    k = qkv[:, hid:2 * hid].astype(jnp.bfloat16)
    v = qkv[:, 2 * hid:].astype(jnp.bfloat16)

    # ---- attention per head (flash-tiled over KV only when needed) ------------------
    kv_t = 512 if Np % 512 == 0 else (256 if Np % 256 == 0 else 128)
    n_kv = Np // kv_t
    kcol = jax.lax.broadcasted_iota(jnp.int32, (1, kv_t), 1)   # broadcastable mask row
    neg_big = jnp.float32(-1e30)

    def _exp(z):
        return jnp.exp(z.astype(jnp.bfloat16)) if bf16_exp else jnp.exp(z)

    head_outs = []
    for h in range(num_heads):
        hsl = slice(h * d, (h + 1) * d)
        qh, kh, vh = q[:, hsl], k[:, hsl], v[:, hsl]        # (Np, d) bf16
        if n_kv == 1:
            # single-KV-tile fast path: no online-softmax carry state
            s = jax.lax.dot_general(qh, kh, (((1,), (1,)), ((), ())),
                                    preferred_element_type=jnp.float32)
            if padded:
                s = jnp.where(kcol < n_valid, s, neg_big)
            m = jnp.max(s, axis=-1, keepdims=True)
            p = _exp(s - m)
            l_i = jnp.sum(p.astype(jnp.float32), axis=-1, keepdims=True)
            o_i = jax.lax.dot_general(p.astype(jnp.bfloat16), vh,
                                      (((1,), (0,)), ((), ())),
                                      preferred_element_type=jnp.float32)
        else:
            m_i = jnp.full((Np, 1), neg_big, jnp.float32)
            l_i = jnp.zeros((Np, 1), jnp.float32)
            o_i = jnp.zeros((Np, d), jnp.float32)
            for t in range(n_kv):                           # flash-style KV tiling
                if t * kv_t >= n_valid:                     # tile is pure padding
                    continue
                ksl = slice(t * kv_t, (t + 1) * kv_t)
                s = jax.lax.dot_general(qh, kh[ksl], (((1,), (1,)), ((), ())),
                                        preferred_element_type=jnp.float32)
                if (t + 1) * kv_t > n_valid:                # mask padded key columns
                    s = jnp.where(kcol + t * kv_t < n_valid, s, neg_big)
                m_new = jnp.maximum(m_i, jnp.max(s, axis=-1, keepdims=True))
                alpha = jnp.exp(m_i - m_new)
                p = _exp(s - m_new)                         # un-normalized (Np, kv_t)
                l_i = alpha * l_i + jnp.sum(p.astype(jnp.float32),
                                            axis=-1, keepdims=True)
                o_i = alpha * o_i + jax.lax.dot_general(
                    p.astype(jnp.bfloat16), vh[ksl], (((1,), (0,)), ((), ())),
                    preferred_element_type=jnp.float32)
                m_i = m_new
        # deferred softmax normalization on the small (Np, d) output (EUP reciprocal)
        head_outs.append(o_i * pl.reciprocal(l_i, approx=True))

    # ---- fused output projection: single hid-deep matmul (C,hid) x (Np,hid)^T -------
    o_all = jnp.concatenate(head_outs, axis=-1).astype(jnp.bfloat16)   # (Np, hid)
    y = jax.lax.dot_general(wp_ref[...], o_all, (((1,), (1,)), ((), ())),
                            preferred_element_type=jnp.float32)        # (C, Np)
    out_ref[0] = (y + bp_ref[...] + x).astype(out_ref.dtype)           # + bias + skip


# ----------------------------------- wrapper -----------------------------------------
def xformers_attention_block(x, params, *, num_heads, head_dim,
                             num_groups=NUM_GROUPS):
    B, C, H, W = x.shape
    N = H * W
    hid = num_heads * head_dim
    Np = ((N + 127) // 128) * 128                 # lane-dense padding (multiple of 128)

    xf = x.reshape(B, C, N)                       # keep the input dtype end-to-end
    if Np != N:
        xf = jnp.pad(xf, ((0, 0), (0, 0), (0, Np - N)))

    f32, bf16 = jnp.float32, jnp.bfloat16
    G = num_groups
    cg = C // G
    gid = jnp.arange(C) // cg
    gsum = (jnp.arange(G)[:, None] == gid[None, :]).astype(f32) / (cg * N)   # (G, C)
    gbc = (gid[:, None] == jnp.arange(G)[None, :]).astype(f32)               # (C, G)

    gamma = params["gamma"].reshape(C, 1).astype(f32)
    beta = params["beta"].reshape(C, 1).astype(f32)
    qscale = 1.0 / math.sqrt(head_dim)
    # fused, pre-transposed QKV weight; score scale folded into the Q slice
    wqkv = jnp.concatenate([params["wq"].astype(f32) * qscale,
                            params["wk"].astype(f32),
                            params["wv"].astype(f32)], axis=0).T.astype(bf16)  # (C,3hid)
    bqkv = jnp.concatenate([params["bq"].astype(f32) * qscale,
                            params["bk"].astype(f32),
                            params["bv"].astype(f32)]).reshape(1, 3 * hid)     # f32
    wp = params["wp"].astype(bf16)                                             # (C, hid)
    bp = params["bp"].reshape(C, 1).astype(f32)

    def fixed(shape):
        return pl.BlockSpec(shape, lambda b, _s=shape: (0,) * len(_s))

    kern = partial(_fused_attn_block_kernel, num_heads=num_heads, head_dim=head_dim,
                   n_valid=N, bf16_exp=_use_bf16_exp())

    out = pl.pallas_call(
        kern,
        out_shape=jax.ShapeDtypeStruct((B, C, Np), x.dtype),
        grid=(B,),
        in_specs=[
            pl.BlockSpec((1, C, Np), lambda b: (b, 0, 0)),   # x (padded)
            fixed((G, C)), fixed((C, G)),                    # group sum / broadcast
            fixed((C, 1)), fixed((C, 1)),                    # gamma, beta
            fixed((C, 3 * hid)), fixed((1, 3 * hid)),        # fused Wqkv, bqkv
            fixed((C, hid)), fixed((C, 1)),                  # Wp, bp
        ],
        out_specs=pl.BlockSpec((1, C, Np), lambda b: (b, 0, 0)),
        compiler_params=pltpu.CompilerParams(
            dimension_semantics=("parallel",),
            vmem_limit_bytes=_vmem_limit_bytes()),
    )(xf, gsum, gbc, gamma, beta, wqkv, bqkv, wp, bp)

    if Np != N:
        out = out[:, :, :N]
    return out.reshape(B, C, H, W)


# ------------------------ pure-JAX f32 reference (correctness) -----------------------
def reference(x, params, *, num_heads, head_dim, num_groups=NUM_GROUPS):
    B, C, H, W = x.shape
    N = H * W
    hid = num_heads * head_dim
    xf = x.reshape(B, C, N).astype(jnp.float32)
    xg = xf.reshape(B, num_groups, (C // num_groups) * N)
    mean = xg.mean(-1, keepdims=True)
    var = ((xg - mean) ** 2).mean(-1, keepdims=True)
    xn = ((xg - mean) / jnp.sqrt(var + EPS)).reshape(B, C, N)
    xn = xn * params["gamma"][None, :, None] + params["beta"][None, :, None]
    xt = xn.transpose(0, 2, 1)                                  # (B, N, C)
    q = (xt @ params["wq"].T + params["bq"]).reshape(B, N, num_heads, head_dim)
    k = (xt @ params["wk"].T + params["bk"]).reshape(B, N, num_heads, head_dim)
    v = (xt @ params["wv"].T + params["bv"]).reshape(B, N, num_heads, head_dim)
    s = jnp.einsum("bnhd,bmhd->bhnm", q, k) / math.sqrt(head_dim)
    p = jax.nn.softmax(s, axis=-1)
    o = jnp.einsum("bhnm,bmhd->bnhd", p, v).reshape(B, N, hid)
    y = o @ params["wp"].T + params["bp"]
    return (y.transpose(0, 2, 1).reshape(B, C, H, W) + x).astype(x.dtype)


if __name__ == "__main__":
    # GroupNorm default num_groups=32 -> in_dim must be a multiple of 32.
    B, C, H, W = 2, 64, 8, 8
    num_heads, head_dim = 2, 32
    hid = num_heads * head_dim

    key = jax.random.PRNGKey(0)
    ks = jax.random.split(key, 9)
    params = {
        "gamma": jnp.ones((C,), jnp.float32),    # GroupNorm affine defaults
        "beta": jnp.zeros((C,), jnp.float32),
        "wq": 0.05 * jax.random.normal(ks[1], (hid, C), jnp.float32),
        "bq": 0.01 * jax.random.normal(ks[2], (hid,), jnp.float32),
        "wk": 0.05 * jax.random.normal(ks[3], (hid, C), jnp.float32),
        "bk": 0.01 * jax.random.normal(ks[4], (hid,), jnp.float32),
        "wv": 0.05 * jax.random.normal(ks[5], (hid, C), jnp.float32),
        "bv": 0.01 * jax.random.normal(ks[6], (hid,), jnp.float32),
        # NOTE: the PyTorch module uses init_scale=0.0 for proj_out (output would
        # collapse to the skip connection); use a small nonzero init so the
        # attention path is actually exercised numerically.
        "wp": 0.05 * jax.random.normal(ks[7], (C, hid), jnp.float32),
        "bp": 0.01 * jax.random.normal(ks[8], (C,), jnp.float32),
    }
    x = jax.random.normal(ks[0], (B, C, H, W), jnp.float32)

    fn = jax.jit(partial(xformers_attention_block,
                         num_heads=num_heads, head_dim=head_dim))
    out = jax.block_until_ready(fn(x, params))

    ref = reference(x, params, num_heads=num_heads, head_dim=head_dim)
    assert out.shape == (B, C, H, W)
    assert out.dtype == x.dtype
    err = float(jnp.max(jnp.abs(out.astype(jnp.float32) - ref.astype(jnp.float32))))
    # bf16-operand MXU (and bf16-exp on v6e/v7x) tolerance vs. pure-f32 reference
    assert err < 3e-2, f"max abs err {err}"
    print("KERNEL_OK")
</pallas_src>

<mosaic_0001>
module attributes {stable_mosaic.version = 11 : i64} {
  func.func @_fused_attn_block_kernel(%arg0: i32, %arg1: memref<1x64x128xf32, #tpu.memory_space<vmem>>, %arg2: memref<32x64xf32, #tpu.memory_space<vmem>>, %arg3: memref<64x32xf32, #tpu.memory_space<vmem>>, %arg4: memref<64x1xf32, #tpu.memory_space<vmem>>, %arg5: memref<64x1xf32, #tpu.memory_space<vmem>>, %arg6: memref<64x192xbf16, #tpu.memory_space<vmem>>, %arg7: memref<1x192xf32, #tpu.memory_space<vmem>>, %arg8: memref<64x64xbf16, #tpu.memory_space<vmem>>, %arg9: memref<64x1xf32, #tpu.memory_space<vmem>>, %arg10: memref<1x64x128xf32, #tpu.memory_space<vmem>>) attributes {dimension_semantics = [#tpu.dimension_semantics<parallel>], iteration_bounds = array<i64: 2>, scalar_prefetch = 0 : i64, scratch_operands = 0 : i64, tpu.core_type = #tpu.core_type<tc>, window_params = [{transform_indices = @transform_0, window_bounds = array<i64: 1, 64, 128>}, {pipeline_mode = #tpu.pipeline_mode<synchronous>, transform_indices = @transform_1, window_bounds = array<i64: 32, 64>}, {pipeline_mode = #tpu.pipeline_mode<synchronous>, transform_indices = @transform_2, window_bounds = array<i64: 64, 32>}, {pipeline_mode = #tpu.pipeline_mode<synchronous>, transform_indices = @transform_3, window_bounds = array<i64: 64, 1>}, {pipeline_mode = #tpu.pipeline_mode<synchronous>, transform_indices = @transform_4, window_bounds = array<i64: 64, 1>}, {pipeline_mode = #tpu.pipeline_mode<synchronous>, transform_indices = @transform_5, window_bounds = array<i64: 64, 192>}, {pipeline_mode = #tpu.pipeline_mode<synchronous>, transform_indices = @transform_6, window_bounds = array<i64: 1, 192>}, {pipeline_mode = #tpu.pipeline_mode<synchronous>, transform_indices = @transform_7, window_bounds = array<i64: 64, 64>}, {pipeline_mode = #tpu.pipeline_mode<synchronous>, transform_indices = @transform_8, window_bounds = array<i64: 64, 1>}, {transform_indices = @transform_9, window_bounds = array<i64: 1, 64, 128>}]} {
    %c0 = arith.constant 0 : index
    %c0_0 = arith.constant 0 : index
    %c0_1 = arith.constant 0 : index
    %0 = vector.load %arg1[%c0, %c0_0, %c0_1] : memref<1x64x128xf32, #tpu.memory_space<vmem>>, vector<1x64x128xf32>
    %1 = vector.shape_cast %0 : vector<1x64x128xf32> to vector<64x128xf32>
    %cst = arith.constant dense<0.000000e+00> : vector<64xf32>
    %2 = vector.multi_reduction <add>, %1, %cst [1] : vector<64x128xf32> to vector<64xf32>
    %3 = vector.shape_cast %2 : vector<64xf32> to vector<64x1xf32>
    %c0_2 = arith.constant 0 : index
    %c0_3 = arith.constant 0 : index
    %4 = vector.load %arg3[%c0_2, %c0_3] : memref<64x32xf32, #tpu.memory_space<vmem>>, vector<64x32xf32>
    %c0_4 = arith.constant 0 : index
    %c0_5 = arith.constant 0 : index
    %5 = vector.load %arg2[%c0_4, %c0_5] : memref<32x64xf32, #tpu.memory_space<vmem>>, vector<32x64xf32>
    %cst_6 = arith.constant dense<0.000000e+00> : vector<32x1xf32>
    %6 = tpu.matmul %5, %3, %cst_6 {dimension_numbers = #tpu.dot_dimension_numbers<[1], [0], [0], [1], [0, 0, 1, 1], [], []>} : vector<32x64xf32>, vector<64x1xf32>, vector<32x1xf32> -> vector<32x1xf32>
    %cst_7 = arith.constant dense<0.000000e+00> : vector<64x1xf32>
    %7 = tpu.matmul %4, %6, %cst_7 {dimension_numbers = #tpu.dot_dimension_numbers<[1], [0], [0], [1], [0, 0, 1, 1], [], []>} : vector<64x32xf32>, vector<32x1xf32>, vector<64x1xf32> -> vector<64x1xf32>
    %8 = vector.broadcast %7 : vector<64x1xf32> to vector<64x128xf32>
    %9 = arith.subf %1, %8 : vector<64x128xf32>
    %10 = tpu.iota {dimensions = array<i32: 1>} : vector<1x128xi32>
    %c64_i32 = arith.constant 64 : i32
    %11 = vector.broadcast %c64_i32 : i32 to vector<1x128xi32>
    %12 = arith.cmpi slt, %10, %11 : vector<1x128xi32>
    %cst_8 = arith.constant 0.000000e+00 : f32
    %13 = vector.shape_cast %12 : vector<1x128xi1> to vector<1x128xi1>
    %14 = vector.broadcast %13 : vector<1x128xi1> to vector<64x128xi1>
    %15 = vector.broadcast %cst_8 : f32 to vector<64x128xf32>
    %16 = arith.select %14, %9, %15 : vector<64x128xi1>, vector<64x128xf32>
    %17 = arith.mulf %16, %16 : vector<64x128xf32>
    %cst_9 = arith.constant dense<0.000000e+00> : vector<64xf32>
    %18 = vector.multi_reduction <add>, %17, %cst_9 [1] : vector<64x128xf32> to vector<64xf32>
    %19 = vector.shape_cast %18 : vector<64xf32> to vector<64x1xf32>
    %c0_10 = arith.constant 0 : index
    %c0_11 = arith.constant 0 : index
    %20 = vector.load %arg3[%c0_10, %c0_11] : memref<64x32xf32, #tpu.memory_space<vmem>>, vector<64x32xf32>
    %c0_12 = arith.constant 0 : index
    %c0_13 = arith.constant 0 : index
    %21 = vector.load %arg2[%c0_12, %c0_13] : memref<32x64xf32, #tpu.memory_space<vmem>>, vector<32x64xf32>
    %cst_14 = arith.constant dense<0.000000e+00> : vector<32x1xf32>
    %22 = tpu.matmul %21, %19, %cst_14 {dimension_numbers = #tpu.dot_dimension_numbers<[1], [0], [0], [1], [0, 0, 1, 1], [], []>} : vector<32x64xf32>, vector<64x1xf32>, vector<32x1xf32> -> vector<32x1xf32>
    %cst_15 = arith.constant dense<0.000000e+00> : vector<64x1xf32>
    %23 = tpu.matmul %20, %22, %cst_15 {dimension_numbers = #tpu.dot_dimension_numbers<[1], [0], [0], [1], [0, 0, 1, 1], [], []>} : vector<64x32xf32>, vector<32x1xf32>, vector<64x1xf32> -> vector<64x1xf32>
    %cst_16 = arith.constant 9.99999997E-7 : f32
    %24 = vector.broadcast %cst_16 : f32 to vector<64x1xf32>
    %25 = arith.addf %23, %24 : vector<64x1xf32>
    %26 = math.rsqrt %25 : vector<64x1xf32>
    %c0_17 = arith.constant 0 : index
    %c0_18 = arith.constant 0 : index
    %27 = vector.load %arg4[%c0_17, %c0_18] : memref<64x1xf32, #tpu.memory_space<vmem>>, vector<64x1xf32>
    %28 = arith.mulf %26, %27 : vector<64x1xf32>
    %29 = vector.broadcast %28 : vector<64x1xf32> to vector<64x128xf32>
    %30 = arith.mulf %16, %29 : vector<64x128xf32>
    %c0_19 = arith.constant 0 : index
    %c0_20 = arith.constant 0 : index
    %31 = vector.load %arg5[%c0_19, %c0_20] : memref<64x1xf32, #tpu.memory_space<vmem>>, vector<64x1xf32>
    %32 = vector.broadcast %31 : vector<64x1xf32> to vector<64x128xf32>
    %33 = arith.addf %30, %32 : vector<64x128xf32>
    %34 = arith.truncf %33 : vector<64x128xf32> to vector<64x128xbf16>
    %c0_21 = arith.constant 0 : index
    %c0_22 = arith.constant 0 : index
    %35 = vector.load %arg6[%c0_21, %c0_22] : memref<64x192xbf16, #tpu.memory_space<vmem>>, vector<64x192xbf16>
    %cst_23 = arith.constant dense<0.000000e+00> : vector<128x192xf32>
    %36 = tpu.matmul %34, %35, %cst_23 {dimension_numbers = #tpu.dot_dimension_numbers<[0], [0], [1], [1], [0, 1, 1, 1], [], []>} : vector<64x128xbf16>, vector<64x192xbf16>, vector<128x192xf32> -> vector<128x192xf32>
    %c0_24 = arith.constant 0 : index
    %c0_25 = arith.constant 0 : index
    %37 = vector.load %arg7[%c0_24, %c0_25] : memref<1x192xf32, #tpu.memory_space<vmem>>, vector<1x192xf32>
    %38 = vector.broadcast %37 : vector<1x192xf32> to vector<128x192xf32>
    %39 = arith.addf %36, %38 : vector<128x192xf32>
    %40 = vector.extract_strided_slice %39 {offsets = [0, 0], sizes = [128, 64], strides = [1, 1]} : vector<128x192xf32> to vector<128x64xf32>
    %41 = arith.truncf %40 : vector<128x64xf32> to vector<128x64xbf16>
    %42 = vector.extract_strided_slice %39 {offsets = [0, 64], sizes = [128, 64], strides = [1, 1]} : vector<128x192xf32> to vector<128x64xf32>
    %43 = arith.truncf %42 : vector<128x64xf32> to vector<128x64xbf16>
    %44 = vector.extract_strided_slice %39 {offsets = [0, 128], sizes = [128, 64], strides = [1, 1]} : vector<128x192xf32> to vector<128x64xf32>
    %45 = arith.truncf %44 : vector<128x64xf32> to vector<128x64xbf16>
    %46 = tpu.iota {dimensions = array<i32: 1>} : vector<1x128xi32>
    %47 = vector.extract_strided_slice %41 {offsets = [0, 0], sizes = [128, 32], strides = [1, 1]} : vector<128x64xbf16> to vector<128x32xbf16>
    %48 = vector.extract_strided_slice %43 {offsets = [0, 0], sizes = [128, 32], strides = [1, 1]} : vector<128x64xbf16> to vector<128x32xbf16>
    %49 = vector.extract_strided_slice %45 {offsets = [0, 0], sizes = [128, 32], strides = [1, 1]} : vector<128x64xbf16> to vector<128x32xbf16>
    %cst_26 = arith.constant dense<0.000000e+00> : vector<128x128xf32>
    %50 = tpu.matmul %47, %48, %cst_26 {dimension_numbers = #tpu.dot_dimension_numbers<[1], [1], [0], [0], [0, 0, 1, 0], [], []>} : vector<128x32xbf16>, vector<128x32xbf16>, vector<128x128xf32> -> vector<128x128xf32>
    %c64_i32_27 = arith.constant 64 : i32
    %51 = vector.broadcast %c64_i32_27 : i32 to vector<1x128xi32>
    %52 = arith.cmpi slt, %46, %51 : vector<1x128xi32>
    %cst_28 = arith.constant -1.000000e+30 : f32
    %53 = vector.shape_cast %52 : vector<1x128xi1> to vector<1x128xi1>
    %54 = vector.broadcast %53 : vector<1x128xi1> to vector<128x128xi1>
    %55 = vector.broadcast %cst_28 : f32 to vector<128x128xf32>
    %56 = arith.select %54, %50, %55 : vector<128x128xi1>, vector<128x128xf32>
    %cst_29 = arith.constant dense<0xFF800000> : vector<128xf32>
    %57 = vector.multi_reduction <maximumf>, %56, %cst_29 [1] : vector<128x128xf32> to vector<128xf32>
    %58 = vector.shape_cast %57 : vector<128xf32> to vector<128x1xf32>
    %59 = vector.broadcast %58 : vector<128x1xf32> to vector<128x128xf32>
    %60 = arith.subf %56, %59 : vector<128x128xf32>
    %61 = math.exp %60 : vector<128x128xf32>
    %cst_30 = arith.constant dense<0.000000e+00> : vector<128xf32>
    %62 = vector.multi_reduction <add>, %61, %cst_30 [1] : vector<128x128xf32> to vector<128xf32>
    %63 = vector.shape_cast %62 : vector<128xf32> to vector<128x1xf32>
    %64 = arith.truncf %61 : vector<128x128xf32> to vector<128x128xbf16>
    %cst_31 = arith.constant dense<0.000000e+00> : vector<128x32xf32>
    %65 = tpu.matmul %64, %49, %cst_31 {dimension_numbers = #tpu.dot_dimension_numbers<[1], [0], [0], [1], [0, 0, 1, 1], [], []>} : vector<128x128xbf16>, vector<128x32xbf16>, vector<128x32xf32> -> vector<128x32xf32>
    %66 = tpu.reciprocal %63 {approx = true} : vector<128x1xf32> -> vector<128x1xf32>
    %67 = vector.broadcast %66 : vector<128x1xf32> to vector<128x32xf32>
    %68 = arith.mulf %65, %67 : vector<128x32xf32>
    %69 = vector.extract_strided_slice %41 {offsets = [0, 32], sizes = [128, 32], strides = [1, 1]} : vector<128x64xbf16> to vector<128x32xbf16>
    %70 = vector.extract_strided_slice %43 {offsets = [0, 32], sizes = [128, 32], strides = [1, 1]} : vector<128x64xbf16> to vector<128x32xbf16>
    %71 = vector.extract_strided_slice %45 {offsets = [0, 32], sizes = [128, 32], strides = [1, 1]} : vector<128x64xbf16> to vector<128x32xbf16>
    %cst_32 = arith.constant dense<0.000000e+00> : vector<128x128xf32>
    %72 = tpu.matmul %69, %70, %cst_32 {dimension_numbers = #tpu.dot_dimension_numbers<[1], [1], [0], [0], [0, 0, 1, 0], [], []>} : vector<128x32xbf16>, vector<128x32xbf16>, vector<128x128xf32> -> vector<128x128xf32>
    %c64_i32_33 = arith.constant 64 : i32
    %73 = vector.broadcast %c64_i32_33 : i32 to vector<1x128xi32>
    %74 = arith.cmpi slt, %46, %73 : vector<1x128xi32>
    %cst_34 = arith.constant -1.000000e+30 : f32
    %75 = vector.shape_cast %74 : vector<1x128xi1> to vector<1x128xi1>
    %76 = vector.broadcast %75 : vector<1x128xi1> to vector<128x128xi1>
    %77 = vector.broadcast %cst_34 : f32 to vector<128x128xf32>
    %78 = arith.select %76, %72, %77 : vector<128x128xi1>, vector<128x128xf32>
    %cst_35 = arith.constant dense<0xFF800000> : vector<128xf32>
    %79 = vector.multi_reduction <maximumf>, %78, %cst_35 [1] : vector<128x128xf32> to vector<128xf32>
    %80 = vector.shape_cast %79 : vector<128xf32> to vector<128x1xf32>
    %81 = vector.broadcast %80 : vector<128x1xf32> to vector<128x128xf32>
    %82 = arith.subf %78, %81 : vector<128x128xf32>
    %83 = math.exp %82 : vector<128x128xf32>
    %cst_36 = arith.constant dense<0.000000e+00> : vector<128xf32>
    %84 = vector.multi_reduction <add>, %83, %cst_36 [1] : vector<128x128xf32> to vector<128xf32>
    %85 = vector.shape_cast %84 : vector<128xf32> to vector<128x1xf32>
    %86 = arith.truncf %83 : vector<128x128xf32> to vector<128x128xbf16>
    %cst_37 = arith.constant dense<0.000000e+00> : vector<128x32xf32>
    %87 = tpu.matmul %86, %71, %cst_37 {dimension_numbers = #tpu.dot_dimension_numbers<[1], [0], [0], [1], [0, 0, 1, 1], [], []>} : vector<128x128xbf16>, vector<128x32xbf16>, vector<128x32xf32> -> vector<128x32xf32>
    %88 = tpu.reciprocal %85 {approx = true} : vector<128x1xf32> -> vector<128x1xf32>
    %89 = vector.broadcast %88 : vector<128x1xf32> to vector<128x32xf32>
    %90 = arith.mulf %87, %89 : vector<128x32xf32>
    %91 = tpu.concatenate %68, %90 in 1 : vector<128x32xf32>, vector<128x32xf32> -> vector<128x64xf32>
    %92 = arith.truncf %91 : vector<128x64xf32> to vector<128x64xbf16>
    %c0_38 = arith.constant 0 : index
    %c0_39 = arith.constant 0 : index
    %93 = vector.load %arg8[%c0_38, %c0_39] : memref<64x64xbf16, #tpu.memory_space<vmem>>, vector<64x64xbf16>
    %cst_40 = arith.constant dense<0.000000e+00> : vector<64x128xf32>
    %94 = tpu.matmul %93, %92, %cst_40 {dimension_numbers = #tpu.dot_dimension_numbers<[1], [1], [0], [0], [0, 0, 1, 0], [], []>} : vector<64x64xbf16>, vector<128x64xbf16>, vector<64x128xf32> -> vector<64x128xf32>
    %c0_41 = arith.constant 0 : index
    %c0_42 = arith.constant 0 : index
    %95 = vector.load %arg9[%c0_41, %c0_42] : memref<64x1xf32, #tpu.memory_space<vmem>>, vector<64x1xf32>
    %96 = vector.broadcast %95 : vector<64x1xf32> to vector<64x128xf32>
    %97 = arith.addf %94, %96 : vector<64x128xf32>
    %98 = arith.addf %97, %1 : vector<64x128xf32>
    %c0_43 = arith.constant 0 : index
    %c0_44 = arith.constant 0 : index
    %c0_45 = arith.constant 0 : index
    %99 = vector.load %arg10[%c0_43, %c0_44, %c0_45] : memref<1x64x128xf32, #tpu.memory_space<vmem>>, vector<1x64x128xf32>
    %100 = vector.shape_cast %99 : vector<1x64x128xf32> to vector<64x128xf32>
    %101 = vector.shape_cast %98 : vector<64x128xf32> to vector<1x64x128xf32>
    tpu.vector_store %arg10[%c0_43, %c0_44, %c0_45], %101 {strides = array<i32>} : memref<1x64x128xf32, #tpu.memory_space<vmem>>, vector<1x64x128xf32>,
    return
  }
  func.func @transform_0(%arg0: i32) -> (i32, i32, i32) {
    %c0_i32 = arith.constant 0 : i32
    %c0_i32_0 = arith.constant 0 : i32
    %c0_i32_1 = arith.constant 0 : i32
    return %arg0, %c0_i32, %c0_i32_0 : i32, i32, i32
  }
  func.func @transform_1(%arg0: i32) -> (i32, i32) {
    %c0_i32 = arith.constant 0 : i32
    %c0_i32_0 = arith.constant 0 : i32
    %c0_i32_1 = arith.constant 0 : i32
    return %c0_i32, %c0_i32_0 : i32, i32
  }
  func.func @transform_2(%arg0: i32) -> (i32, i32) {
    %c0_i32 = arith.constant 0 : i32
    %c0_i32_0 = arith.constant 0 : i32
    %c0_i32_1 = arith.constant 0 : i32
    return %c0_i32, %c0_i32_0 : i32, i32
  }
  func.func @transform_3(%arg0: i32) -> (i32, i32) {
    %c0_i32 = arith.constant 0 : i32
    %c0_i32_0 = arith.constant 0 : i32
    %c0_i32_1 = arith.constant 0 : i32
    return %c0_i32, %c0_i32_0 : i32, i32
  }
  func.func @transform_4(%arg0: i32) -> (i32, i32) {
    %c0_i32 = arith.constant 0 : i32
    %c0_i32_0 = arith.constant 0 : i32
    %c0_i32_1 = arith.constant 0 : i32
    return %c0_i32, %c0_i32_0 : i32, i32
  }
  func.func @transform_5(%arg0: i32) -> (i32, i32) {
    %c0_i32 = arith.constant 0 : i32
    %c0_i32_0 = arith.constant 0 : i32
    %c0_i32_1 = arith.constant 0 : i32
    return %c0_i32, %c0_i32_0 : i32, i32
  }
  func.func @transform_6(%arg0: i32) -> (i32, i32) {
    %c0_i32 = arith.constant 0 : i32
    %c0_i32_0 = arith.constant 0 : i32
    %c0_i32_1 = arith.constant 0 : i32
    return %c0_i32, %c0_i32_0 : i32, i32
  }
  func.func @transform_7(%arg0: i32) -> (i32, i32) {
    %c0_i32 = arith.constant 0 : i32
    %c0_i32_0 = arith.constant 0 : i32
    %c0_i32_1 = arith.constant 0 : i32
    return %c0_i32, %c0_i32_0 : i32, i32
  }
  func.func @transform_8(%arg0: i32) -> (i32, i32) {
    %c0_i32 = arith.constant 0 : i32
    %c0_i32_0 = arith.constant 0 : i32
    %c0_i32_1 = arith.constant 0 : i32
    return %c0_i32, %c0_i32_0 : i32, i32
  }
  func.func @transform_9(%arg0: i32) -> (i32, i32, i32) {
    %c0_i32 = arith.constant 0 : i32
    %c0_i32_0 = arith.constant 0 : i32
    %c0_i32_1 = arith.constant 0 : i32
    return %arg0, %c0_i32, %c0_i32_0 : i32, i32, i32
  }
}

</mosaic_0001>

<bundles_post_ra>
// kernel: xformers_attention_block.1
= control target key start
LH: loop header
LB: loop body
LE: loop exit
PB: predicated region body
PF: predicated region fallthrough
CT: control target
= control target key end

     0   :  { %s5159_s0 = inlined_call_operand.hbm [shape: f32[2,64,128], index: 0, kind: input, shape index: {}]   ;;  %s5160_s1 = inlined_call_operand.hbm [shape: f32[32,64], index: 1, kind: input, shape index: {}]   ;;  %s5161_s2 = inlined_call_operand.hbm [shape: f32[64,32], index: 2, kind: input, shape index: {}]   ;;  %s5162_s3 = inlined_call_operand.hbm [shape: f32[64,1], index: 3, kind: input, shape index: {}]   ;;  %s5163_s4 = inlined_call_operand.hbm [shape: f32[64,1], index: 4, kind: input, shape index: {}]   ;;  %s5164_s5 = inlined_call_operand.hbm [shape: bf16[64,192], index: 5, kind: input, shape index: {}]   ;;  %s5165_s6 = inlined_call_operand.hbm [shape: f32[1,192], index: 6, kind: input, shape index: {}]   ;;  %s5166_s7 = inlined_call_operand.hbm [shape: bf16[64,64], index: 7, kind: input, shape index: {}]   ;;  %s5167_s8 = inlined_call_operand.hbm [shape: f32[64,1], index: 8, kind: input, shape index: {}]   ;;  %s5168_s9 = inlined_call_operand.hbm [shape: f32[2,64,128], index: 9, kind: output, shape index: {}]  }
   0x1   :  { %5177 = sst [smem:[#allocation24_spill]] %s5160_s1 }
   0x2   :  { %5178 = sst [smem:[#allocation25_spill]] %s5161_s2 }
   0x3   :  { %5179 = sst [smem:[#allocation26_spill]] %s5168_s9 }
   0x4   :  { %14 = vsyncpa [#allocation3], 0 }
   0x5   :  { %16 = vsyncpa [#allocation3 + $0x1], 0 }
   0x6   :  { %17 = vsyncpa [#allocation6], 0 }
   0x7   :  { %18 = vsyncpa [#allocation9], 0 }
   0x8   :  { %19 = vsyncpa [#allocation12], 0 }
   0x9   :  { %20 = vsyncpa [#allocation15], 0 }
   0xa   :  { %21 = vsyncpa [#allocation4], 0 }
   0xb   :  { %23 = vsyncpa [#allocation4 + $0x1], 0  ;;  %s4001_s30 = smov 0   ;;  %s4003_s10 = smov 0  }
   0xc   :  { %s4005_s11 = smov 0   ;;  %s4007_s12 = smov 0  }
   0xd LB: > { %s3931_s13 = smov [#allocation5]   ;;  %s4022_s15 = sadd.s32 4294967295, %s3929_s12   ;;  %s3929_s12 = sphi %s4007_s12, %s5209_s12   ;;  %s3925_s11 = sphi %s4005_s11, %s5208_s11   ;;  %s3921_s10 = sphi %s4003_s10, %s5207_s10   ;;  %s3917_s30 = sphi %s4001_s30, %s5206_s30  }
   0xe   : > { %s266_s14 = sshll.u32 %s3931_s13, 4  ;;  %p2719_p0 = scmp.ge.s32.totalorder %s3929_s12, 1  ;;  %s4027_s14 = int_to_ptr.vmem [resolvable:$true] %s266_s14 }
   0xf   : > { %p5170_p1 = scmp.eq.s32.totalorder %s4022_s15, 0  ;;  %p254_p2 = scmp.lt.s32.totalorder %s3929_s12, 3 }
  0x10   : > { %s3932_s17 = smov [#allocation8]   ;;  %s3933_s20 = smov [#allocation11]  }
  0x11   : > { %p4029_p3 = pnand %p2719_p0, %p254_p2  ;;  %s292_s18 = sshll.u32 %s3932_s17, 4  ;;  %s4042_s18 = int_to_ptr.vmem [resolvable:$true] %s292_s18 }
  0x12   : > { %s318_s21 = sshll.u32 %s3933_s20, 4  ;;  %s5182_s1 = sld [smem:[#allocation24_spill]]  ;;  %s4044_s21 = int_to_ptr.vmem [resolvable:$true] %s318_s21 }
  0x13   : > { %s5180_s16 = scalar_select %p4029_p3, 1, 0 }
  0x14   : > { %p3282_p5 = pneg %p4029_p3 }
  0x16   : > { %p4038_p6 = pnand %p3282_p5, %p5170_p1 }
  0x18   : > { %s3593_s24 = scalar_lea.hbm %s5182_s1, 512  ;;  %p4054_p8 = pneg %p4038_p6 }
  0x19   : > { %p3594_p7 = scmp.ne.s32.totalorder %s5182_s1, %s3593_s24  ;;  %p3600_p11 = scmp.lt.u32.totalorder %s3593_s24, %s5182_s1 }
  0x1b   : > { %p3596_p9 = pnand %p4054_p8, %p3594_p7 }
  0x1d   : > { %p3597_p10 = pneg %p3596_p9 }
  0x1f   : > { %p3602_p12 = pnand %p3600_p11, %p3597_p10 }
  0x21   : > { %3605 = shalt.err (!%p3602_p12)
}
  0x22   : > { %s3606_s13 = scalar_lea.vmem %s4027_s14, 512  ;;  %p3614_p5 = scmp.lt.s32.totalorder %s4027_s14, %s4027_s14 }
  0x23   : > { %p3607_p13 = scmp.ne.s32.totalorder %s4027_s14, %s3606_s13  ;;  %p3615_p4 = scmp.lt.s32.totalorder %s3606_s13, %s3606_s13 }
  0x25   : > { %p3609_p0 = pnand %p3607_p13, %p4054_p8  ;;  %p3616_p7 = por %p3615_p4, %p3614_p5 }
  0x27   : > { %p3610_p2 = pneg %p3609_p0 }
  0x29   : > { %p3617_p9 = pnand %p3616_p7, %p3610_p2 }
  0x2b   : > { %3620 = shalt.err (!%p3617_p9)
}
  0x2c   : > { %s5172_s17 = smov 128   ;;  %s5174_s20 = smov 8  }
  0x2d   : > { %3285 = dma.hbm_to_vmem [thread:$0]  (!%p4038_p6), %s5182_s1, 512, %s4027_s14, [#allocation6], %s5172_s17, %s5172_s17, %s5174_s20  }
  0x2e   : > { %s3621_s26 = scalar_lea.hbm %s5162_s3, 1024 }
  0x2f   : > { %p3622_p4 = scmp.ne.s32.totalorder %s5162_s3, %s3621_s26  ;;  %p3628_p12 = scmp.lt.u32.totalorder %s3621_s26, %s5162_s3 }
  0x31   : > { %p3624_p10 = pnand %p3622_p4, %p4054_p8 }
  0x33   : > { %p3625_p11 = pneg %p3624_p10 }
  0x35   : > { %p3630_p13 = pnand %p3628_p12, %p3625_p11 }
  0x37   : > { %3633 = shalt.err (!%p3630_p13)
}
  0x38   : > { %s3634_s14 = scalar_lea.vmem %s4042_s18, 1024  ;;  %p3642_p7 = scmp.lt.s32.totalorder %s4042_s18, %s4042_s18 }
  0x39   : > { %p3635_p0 = scmp.ne.s32.totalorder %s4042_s18, %s3634_s14  ;;  %p3643_p9 = scmp.lt.s32.totalorder %s3634_s14, %s3634_s14 }
  0x3b   : > { %p3637_p2 = pnand %p3635_p0, %p4054_p8  ;;  %p3644_p4 = por %p3643_p9, %p3642_p7 }
  0x3d   : > { %p3638_p5 = pneg %p3637_p2 }
  0x3f   : > { %p3645_p10 = pnand %p3644_p4, %p3638_p5 }
  0x41   : > { %3648 = shalt.err (!%p3645_p10)
}
  0x42   : > { %3291 = dma.hbm_to_vmem [thread:$0]  (!%p4038_p6), %s5162_s3, 1024, %s4042_s18, [#allocation9], %s5172_s17, %s5172_s17, %s5174_s20  }
  0x43   : > { %s3649_s25 = scalar_lea.hbm %s5164_s5, 1024 }
  0x44   : > { %p3650_p11 = scmp.ne.s32.totalorder %s5164_s5, %s3649_s25  ;;  %p3656_p0 = scmp.lt.u32.totalorder %s3649_s25, %s5164_s5 }
  0x46   : > { %p3652_p12 = pnand %p3650_p11, %p4054_p8 }
  0x48   : > { %p3653_p13 = pneg %p3652_p12 }
  0x4a   : > { %p3658_p2 = pnand %p3656_p0, %p3653_p13 }
  0x4c   : > { %3661 = shalt.err (!%p3658_p2)
}
  0x4d   : > { %s3662_s18 = scalar_lea.vmem %s4044_s21, 1024  ;;  %p3670_p4 = scmp.lt.s32.totalorder %s4044_s21, %s4044_s21 }
  0x4e   : > { %p3663_p5 = scmp.ne.s32.totalorder %s4044_s21, %s3662_s18  ;;  %p3671_p10 = scmp.lt.s32.totalorder %s3662_s18, %s3662_s18 }
  0x50   : > { %p3665_p7 = pnand %p3663_p5, %p4054_p8  ;;  %p3672_p11 = por %p3671_p10, %p3670_p4 }
  0x52   : > { %p3666_p9 = pneg %p3665_p7 }
  0x54   : > { %p3673_p12 = pnand %p3672_p11, %p3666_p9 }
  0x56   : > { %3676 = shalt.err (!%p3673_p12)
}
  0x57   : > { %3297 = dma.hbm_to_vmem [thread:$0]  (!%p4038_p6), %s5164_s5, 1024, %s4044_s21, [#allocation12], %s5172_s17, %s5172_s17, %s5174_s20  }
  0x58   : > { %s3936_s22 = smov [#allocation14]   ;;  %s3677_s26 = scalar_lea.hbm %s5166_s7, 512 }
  0x59   : > { %s342_s23 = sshll.u32 %s3936_s22, 4  ;;  %p3678_p13 = scmp.ne.s32.totalorder %s5166_s7, %s3677_s26  ;;  %s343_s23 = int_to_ptr.vmem [resolvable:$true] %s342_s23 }
  0x5a   : > { %p3684_p5 = scmp.lt.u32.totalorder %s3677_s26, %s5166_s7 }
  0x5b   : > { %p3680_p0 = pnand %p3678_p13, %p4054_p8 }
  0x5d   : > { %p3681_p2 = pneg %p3680_p0 }
  0x5f   : > { %p3686_p7 = pnand %p3684_p5, %p3681_p2 }
  0x61   : > { %3689 = shalt.err (!%p3686_p7)
}
  0x62   : > { %s3690_s21 = scalar_lea.vmem %s343_s23, 512  ;;  %p3698_p11 = scmp.lt.s32.totalorder %s343_s23, %s343_s23 }
  0x63   : > { %p3691_p9 = scmp.ne.s32.totalorder %s343_s23, %s3690_s21  ;;  %p3699_p12 = scmp.lt.s32.totalorder %s3690_s21, %s3690_s21 }
  0x65   : > { %p3693_p4 = pnand %p3691_p9, %p4054_p8  ;;  %p3700_p1 = por %p3699_p12, %p3698_p11 }
  0x67   : > { %p3694_p10 = pneg %p3693_p4 }
  0x69   : > { %p3701_p3 = pnand %p3700_p1, %p3694_p10 }
  0x6b   : > { %3704 = shalt.err (!%p3701_p3)
}
  0x6c   : > { %s3937_s14 = smov 64   ;;  %s3938_s9 = smov 4  }
  0x6d   : > { %3303 = dma.hbm_to_vmem [thread:$0]  (!%p4038_p6), %s5166_s7, 512, %s343_s23, [#allocation15], %s3937_s14, %s3937_s14, %s3938_s9  }
  0x6e   : > { %s3939_s25 = smov [#allocation7]   ;;  %s3940_s28 = smov [#allocation10]  }
  0x6f   : > { %s279_s26 = sshll.u32 %s3939_s25, 4  ;;  %s305_s29 = sshll.u32 %s3940_s28, 4  ;;  %s280_s26 = int_to_ptr.vmem [resolvable:$true] %s279_s26  ;;  %s4148_s29 = int_to_ptr.vmem [resolvable:$true] %s305_s29 }
  0x70   : > { %s5184_s2 = sld [smem:[#allocation25_spill]] }
  0x76   : > { %s3705_s21 = scalar_lea.hbm %s5184_s2, 1024 }
  0x77   : > { %p3706_p1 = scmp.ne.s32.totalorder %s5184_s2, %s3705_s21  ;;  %p3712_p0 = scmp.lt.u32.totalorder %s3705_s21, %s5184_s2 }
  0x79   : > { %p3708_p3 = pnand %p3706_p1, %p4054_p8 }
  0x7b   : > { %p3709_p13 = pneg %p3708_p3 }
  0x7d   : > { %p3714_p2 = pnand %p3712_p0, %p3709_p13 }
  0x7f   : > { %3717 = shalt.err (!%p3714_p2)
}
  0x80   : > { %s3718_s14 = scalar_lea.vmem %s280_s26, 1024  ;;  %p3726_p4 = scmp.lt.s32.totalorder %s280_s26, %s280_s26 }
  0x81   : > { %p3719_p5 = scmp.ne.s32.totalorder %s280_s26, %s3718_s14  ;;  %p3727_p10 = scmp.lt.s32.totalorder %s3718_s14, %s3718_s14 }
  0x83   : > { %p3721_p7 = pnand %p3719_p5, %p4054_p8  ;;  %p3728_p11 = por %p3727_p10, %p3726_p4 }
  0x85   : > { %p3722_p9 = pneg %p3721_p7 }
  0x87   : > { %p3729_p12 = pnand %p3728_p11, %p3722_p9 }
  0x89   : > { %3732 = shalt.err (!%p3729_p12)
}
  0x8a   : > { %s5185_s17 = smov 8   ;;  %s5186_s20 = smov 128  }
  0x8b   : > { %3288 = dma.hbm_to_vmem [thread:$0]  (!%p4038_p6), %s5184_s2, 1024, %s280_s26, [#allocation6], %s5186_s20, %s5186_s20, %s5185_s17  }
  0x8c   : > { %s3733_s13 = scalar_lea.hbm %s5163_s4, 1024 }
  0x8d   : > { %p3734_p1 = scmp.ne.s32.totalorder %s5163_s4, %s3733_s13  ;;  %p3740_p0 = scmp.lt.u32.totalorder %s3733_s13, %s5163_s4 }
  0x8f   : > { %p3736_p3 = pnand %p3734_p1, %p4054_p8 }
  0x91   : > { %p3737_p13 = pneg %p3736_p3 }
  0x93   : > { %p3742_p2 = pnand %p3740_p0, %p3737_p13 }
  0x95   : > { %3745 = shalt.err (!%p3742_p2)
}
  0x96   : > { %s3746_s26 = scalar_lea.vmem %s4148_s29, 1024  ;;  %p3754_p4 = scmp.lt.s32.totalorder %s4148_s29, %s4148_s29 }
  0x97   : > { %p3747_p5 = scmp.ne.s32.totalorder %s4148_s29, %s3746_s26  ;;  %p3755_p10 = scmp.lt.s32.totalorder %s3746_s26, %s3746_s26 }
  0x99   : > { %p3749_p7 = pnand %p3747_p5, %p4054_p8  ;;  %p3756_p11 = por %p3755_p10, %p3754_p4 }
  0x9b   : > { %p3750_p9 = pneg %p3749_p7 }
  0x9d   : > { %p3757_p12 = pnand %p3756_p11, %p3750_p9 }
  0x9f   : > { %3760 = shalt.err (!%p3757_p12)
}
  0xa0   : > { %3294 = dma.hbm_to_vmem [thread:$0]  (!%p4038_p6), %s5163_s4, 1024, %s4148_s29, [#allocation9], %s5186_s20, %s5186_s20, %s5185_s17  }
  0xa1   : > { %s3941_s24 = smov [#allocation13]   ;;  %s3942_s28 = smov [#allocation16]  }
  0xa2   : > { %s332_s25 = sshll.u32 %s3941_s24, 4  ;;  %s355_s13 = sshll.u32 %s3942_s28, 4  ;;  %s333_s25 = int_to_ptr.vmem [resolvable:$true] %s332_s25  ;;  %s4197_s13 = int_to_ptr.vmem [resolvable:$true] %s355_s13 }
  0xa3   : > { %s3761_s22 = scalar_lea.hbm %s5165_s6, 32 }
  0xa4   : > { %p3762_p1 = scmp.ne.s32.totalorder %s5165_s6, %s3761_s22  ;;  %p3768_p0 = scmp.lt.u32.totalorder %s3761_s22, %s5165_s6 }
  0xa6   : > { %p3764_p3 = pnand %p3762_p1, %p4054_p8 }
  0xa8   : > { %p3765_p13 = pneg %p3764_p3 }
  0xaa   : > { %p3770_p2 = pnand %p3768_p0, %p3765_p13 }
  0xac   : > { %3773 = shalt.err (!%p3770_p2)
}
  0xad   : > { %s3774_s9 = scalar_lea.vmem %s333_s25, 32  ;;  %p3782_p4 = scmp.lt.s32.totalorder %s333_s25, %s333_s25 }
  0xae   : > { %p3775_p5 = scmp.ne.s32.totalorder %s333_s25, %s3774_s9  ;;  %p3783_p10 = scmp.lt.s32.totalorder %s3774_s9, %s3774_s9 }
  0xb0   : > { %p3777_p7 = pnand %p3775_p5, %p4054_p8  ;;  %p3784_p11 = por %p3783_p10, %p3782_p4 }
  0xb2   : > { %p3778_p9 = pneg %p3777_p7 }
  0xb4   : > { %p3785_p12 = pnand %p3784_p11, %p3778_p9 }
  0xb6   : > { %3788 = shalt.err (!%p3785_p12)
}
  0xb7   : > { %3300 = dma.hbm_to_vmem [thread:$0]  (!%p4038_p6), %s5165_s6, 32, %s333_s25, [#allocation12]  }
  0xb8   : > { %s3789_s22 = scalar_lea.hbm %s5167_s8, 1024 }
  0xb9   : > { %p3790_p1 = scmp.ne.s32.totalorder %s5167_s8, %s3789_s22  ;;  %p3796_p0 = scmp.lt.u32.totalorder %s3789_s22, %s5167_s8 }
  0xbb   : > { %p3792_p3 = pnand %p3790_p1, %p4054_p8 }
  0xbd   : > { %p3793_p13 = pneg %p3792_p3 }
  0xbf   : > { %p3798_p2 = pnand %p3796_p0, %p3793_p13 }
  0xc1   : > { %3801 = shalt.err (!%p3798_p2)
}
  0xc2   : > { %s3802_s25 = scalar_lea.vmem %s4197_s13, 1024  ;;  %p3810_p4 = scmp.lt.s32.totalorder %s4197_s13, %s4197_s13 }
  0xc3   : > { %p3803_p5 = scmp.ne.s32.totalorder %s4197_s13, %s3802_s25  ;;  %p3811_p10 = scmp.lt.s32.totalorder %s3802_s25, %s3802_s25 }
  0xc5   : > { %p3805_p7 = pnand %p3803_p5, %p4054_p8  ;;  %p3812_p11 = por %p3811_p10, %p3810_p4 }
  0xc7   : > { %p3806_p9 = pneg %p3805_p7 }
  0xc9   : > { %p3813_p12 = pnand %p3812_p11, %p3806_p9 }
  0xcb   : > { %3816 = shalt.err (!%p3813_p12)
}
  0xcc   : > { %3306 = dma.hbm_to_vmem [thread:$0]  (!%p4038_p6), %s5167_s8, 1024, %s4197_s13, [#allocation15], %s5186_s20, %s5186_s20, %s5185_s17  }
  0xcd   : > { %s2718_s19 = sadd.s32 4294967294, %s3929_s12   ;;  %s4245_s27 = sadd.s32 1, %s3929_s12  }
  0xce   : > { %s33_s28 = ssub.s32 %s3929_s12, %s4245_s27  ;;  %s36_s18 = sadd.s32 1, %s3925_s11 }
  0xcf   : > { %p34_p8 = scmp.eq.s32.totalorder %s33_s28, 0  ;;  %p43_p1 = scmp.ne.s32.totalorder %s3925_s11, %s3921_s10 }
  0xd0   : > { %p44_p3 = scmp.eq.s32.totalorder %s3929_s12, 0  ;;  %p49_p13 = scmp.ne.s32.totalorder %s3921_s10, %s3917_s30 }
  0xd1   : > { %s4256_s21 = scalar_select %p34_p8, %s3925_s11, %s36_s18  }
  0xd2   : > { %p4258_p0 = por %p44_p3, %p43_p1  ;;  %p5188_p2 = scmp.eq.s32.totalorder %s4022_s15, 0 }
  0xd3   : > { %p241_p5 = scmp.eq.s32.totalorder %s4022_s15, 1  ;;  %p247_p7 = scmp.eq.s32.totalorder %s2718_s19, 1 }
  0xd4   : > { %p4264_p6 = por %p5188_p2, %p49_p13  ;;  %p3323_p9 = scmp.lt.s32.totalorder %s3929_s12, 2 }
  0xd5   : > { %s369_s23 = sand.u32 1, %s3925_s11   ;;  %p4271_p4 = por %p241_p5, %p43_p1 }
  0xd6   : > { %p4275_p10 = por %p247_p7, %p49_p13  ;;  %s2729_s29 = sshll.u32 %s369_s23, 6 }
  0xd7   : > { %s5190_s26 = scalar_select %p4271_p4, 1, 0 }
  0xd8   : > { %s5191_s14 = scalar_select %p4275_p10, 1, 0 }
  0xd9   : > { %s2812_s25 = sshll.u32 %s3929_s12, 10  ;;  %s373_s19 = scalar_lea.vmem [#allocation2], %s2729_s29 }
  0xda   : > { %s4283_s28 = scalar_lea.hbm %s5159_s0, %s2812_s25  ;;  %s380_s18 = sshll.u32 %s373_s19, 4  ;;  %s4285_s18 = int_to_ptr.vmem [resolvable:$true] %s380_s18 }
  0xdb   : > { %p4289_p11 = pnand %p3323_p9, %p4258_p0  ;;  %s4293_s2 = scalar_lea.sflag [#allocation3], %s369_s23 }
  0xdc   : > { %s3817_s9 = scalar_lea.hbm %s4283_s28, 1024  ;;  %s3822_s22 = scalar_lea.hbm %s5159_s0, 2048 }
  0xdd   : > { %p3818_p12 = scmp.ne.s32.totalorder %s4283_s28, %s3817_s9  ;;  %p3819_p8 = pneg %p4289_p11 }
  0xde   : > { %p3823_p13 = scmp.lt.u32.totalorder %s4283_s28, %s5159_s0  ;;  %p3824_p0 = scmp.lt.u32.totalorder %s3822_s22, %s3817_s9 }
  0xdf   : > { %p3820_p1 = pnand %p3819_p8, %p3818_p12  ;;  %p3826_p5 = scmp.lt.u32.totalorder %s3817_s9, %s4283_s28 }
  0xe0   : > { %p3825_p2 = por %p3824_p0, %p3823_p13 }
  0xe1   : > { %p3821_p3 = pneg %p3820_p1 }
  0xe2   : > { %p3827_p7 = por %p3826_p5, %p3825_p2 }
  0xe4   : > { %p3828_p9 = pnand %p3827_p7, %p3821_p3 }
  0xe6   : > { %3831 = shalt.err (!%p3828_p9)
}
  0xe7   : > { %s3832_s23 = scalar_lea.vmem %s4285_s18, 1024  ;;  %s3943_s29 = smov [#allocation2]  }
  0xe8   : > { %p3833_p12 = scmp.ne.s32.totalorder %s4285_s18, %s3832_s23  ;;  %s3837_s25 = sshll.u32 %s3943_s29, 4  ;;  %s3838_s25 = int_to_ptr.vmem [resolvable:$false] %s3837_s25 }
  0xe9   : > { %s3839_s24 = scalar_lea.vmem %s3838_s25, 2048  ;;  %p3840_p4 = scmp.lt.s32.totalorder %s4285_s18, %s3838_s25 }
  0xea   : > { %p3835_p1 = pnand %p3833_p12, %p3819_p8  ;;  %p3841_p13 = scmp.lt.s32.totalorder %s3839_s24, %s3832_s23 }
  0xec   : > { %p3836_p10 = pneg %p3835_p1  ;;  %p3842_p0 = por %p3841_p13, %p3840_p4 }
  0xee   : > { %p3843_p2 = pnand %p3842_p0, %p3836_p10 }
  0xf0   : > { %3846 = shalt.err (!%p3843_p2)
}
  0xf1   : > { %3310 = dma.hbm_to_vmem [thread:$0]  (!%p4289_p11), %s4283_s28, 1024, %s4285_s18, %s4293_s2, %s5186_s20, %s5186_s20, %s5185_s17  }
  0xf2   : > { %p5193_p8 = scmp.ne.s32.totalorder %s5180_s16, 0 }
  0xf3   : > { %s4327_s9 = sand.u32 (!%p5193_p8), 1, %s3921_s10  }
  0xf4   : > { %392 = sbr.rel (%p5193_p8) target bundleno = 3423 (0xd5f), region = 56  ;;  %s2733_s22 = sshll.u32 (!%p5193_p8), %s4327_s9, 6 }
  0xf5   : > { %s395_s19 = scalar_lea.sflag (!%p5193_p8), [#allocation3], %s4327_s9  ;;  %s4333_s1 = scalar_lea.vmem (!%p5193_p8), [#allocation2], %s2733_s22 }
  0xfb   : > { %3892 = dma.done.wait (%p4264_p6), %s395_s19, 1024  }
  0xfc   : > { %3894 = vsyncadd (%p4264_p6), %s395_s19, 4294966272  ;;  %p5194_p4 = scmp.eq.s32.totalorder %s4022_s15, 0 }
  0xfe   : > { %3896 = dma.done.wait (%p5194_p4), [#allocation6], 1536   ;;  %p5195_p10 = pmov %p5194_p4 }
  0xff   : > { %p5196_p11 = pmov %p5194_p4 }
 0x100   : > { %3898 = vsyncadd (%p5195_p10), [#allocation6], 4294965760 }
 0x101   : > { %3900 = dma.done.wait (%p5196_p11), [#allocation9], 2048   ;;  %p5197_p3 = pmov %p5194_p4 }
 0x103   : > { %3902 = vsyncadd (%p5197_p3), [#allocation9], 4294965248  ;;  %p5198_p5 = pmov %p5197_p3 }
 0x104   : > { %p5199_p7 = pmov %p5197_p3 }
 0x105   : > { %3904 = dma.done.wait (%p5198_p5), [#allocation12], 1056  }
 0x106   : > { %3906 = vsyncadd (%p5199_p7), [#allocation12], 4294966240  ;;  %p5200_p6 = pmov %p5197_p3 }
 0x107   : > { %p5201_p9 = pmov %p5197_p3 }
 0x108   : > { %3908 = dma.done.wait (%p5200_p6), [#allocation15], 1536  }
 0x109   : > { %3910 = vsyncadd (%p5201_p9), [#allocation15], 4294965760  ;;  %v4356_v0 = vld [vmem:[%s4333_s1 + $0x10] sm:$0xff]  ;;  %v4359_v1 = vld [vmem:[%s4333_s1] sm:$0xff]  ;;  %vm502_vm0 = vcmask 523264   ;;  %vm600_vm1 = vcmask 261120   ;;  %v778_v47 = vlaneseq }
 0x10a   : > { %478 = vadd.xlane.f32.xlu1 %v4356_v0  ;;  %474 = vadd.xlane.f32.xlu0 %v4359_v1  ;;  %v4364_v2 = vld [vmem:[%s4333_s1 + $0x18] sm:$0xff]  ;;  %v4367_v3 = vld [vmem:[%s4333_s1 + $0x8] sm:$0xff]  ;;  %v4373_v5 = vld [vmem:[%s4333_s1 + $0x20] sm:$0xff]  ;;  %v3944_v25 = vmov 0   ;;  %s3945_s2 = smov 64   ;;  %s3946_s16 = smov 32  }
 0x10b   : > { %v4370_v4 = vld [vmem:[%s4333_s1 + $0x28] sm:$0xff]  ;;  %v4380_v6 = vld [vmem:[%s4333_s1 + $0x38] sm:$0xff]  ;;  %v4383_v7 = vld [vmem:[%s4333_s1 + $0x30] sm:$0xff]  ;;  %3384 = vset.pattern.permute.xlu1 %v3944_v25  ;;  %3383 = vset.pattern.permute.xlu0 %v3944_v25  ;;  %v4434_v48 = vand.u32 127, %v778_v47  ;;  %s3947_s17 = smov 96   ;;  %s5092_s20 = scalar_lea.vmem [#allocation17], %s2733_s22 }
 0x10c   : > { %v498_v8 = vld [vmem:[#allocation5] sm:$0xff]  ;;  %v4388_v21 = vld [vmem:[#allocation5 + $0x8] sm:$0xff]  ;;  %v4390_v22 = vld [vmem:[#allocation5 + $0x10] sm:$0xff]  ;;  %s2569_s13 = sshll.u32 %s5092_s20, 4  ;;  %s2813_s28 = sshll.u32 %s4022_s15, 10  ;;  %s5103_s13 = int_to_ptr.vmem [resolvable:$true] %s2569_s13 }
 0x10d   : > { %2954 = vmatprep.mubr.msk.f32.mxu1 %vm502_vm0, %v498_v8  ;;  %v4396_v23 = vld [vmem:[#allocation5 + $0x18] sm:$0xff]  ;;  %v490_v24 = vld [vmem:[#allocation7] sm:$0xff]  ;;  %v4404_v32 = vld [vmem:[#allocation7 + $0x8] sm:$0xff]  ;;  %vm780_vm2 = vcmp.lt.s32.totalorder %v4434_v48, 64  ;;  %s5202_s23 = sld [smem:[#allocation26_spill]]  ;;  %s2556_s25 = scalar_lea.sflag [#allocation4], %s4327_s9 }
 0x10e   : > { %480 = vadd.xlane.f32.xlu1 %v4364_v2  ;;  %476 = vadd.xlane.f32.xlu0 %v4367_v3  ;;  %v4406_v33 = vld [vmem:[#allocation7 + $0x10] sm:$0xff]  ;;  %v4412_v34 = vld [vmem:[#allocation7 + $0x18] sm:$0xff]  ;;  %v4414_v35 = vld [vmem:[#allocation7 + $0x20] sm:$0xff]  ;;  %s3847_s24 = scalar_lea.vmem %s5103_s13, 1024  ;;  %p5203_p1 = scmp.ne.s32.totalorder %s5190_s26, 0 }
 0x10f   : > { %3010 = vmatprep.mubr.msk.f32.mxu0 %vm600_vm1, %v490_v24  ;;  %v4420_v36 = vld [vmem:[#allocation7 + $0x28] sm:$0xff]  ;;  %v4422_v37 = vld [vmem:[#allocation7 + $0x30] sm:$0xff]  ;;  %v4428_v38 = vld [vmem:[#allocation7 + $0x38] sm:$0xff]  ;;  %p3848_p12 = scmp.ne.s32.totalorder %s5103_s13, %s3847_s24  ;;  %s3948_s22 = smov [#allocation17]  }
 0x110   : > { %s3851_s19 = sshll.u32 %s3948_s22, 4  ;;  %s3852_s19 = int_to_ptr.vmem [resolvable:$false] %s3851_s19 }
 0x111   : > { %p3849_p13 = pnand %p3848_p12, %p5203_p1  ;;  %p3854_p2 = scmp.lt.s32.totalorder %s5103_s13, %s3852_s19 }
 0x112   : > { %484 = vadd.xlane.f32.xlu1 %v4370_v4  ;;  %482 = vadd.xlane.f32.xlu0 %v4373_v5 }
 0x113   : > { %s5111_s29 = scalar_lea.hbm %s5202_s23, %s2813_s28  ;;  %p3850_p0 = pneg %p3849_p13 }
 0x116   : > { %488 = vadd.xlane.f32.xlu1 %v4380_v6  ;;  %486 = vadd.xlane.f32.xlu0 %v4383_v7 }
 0x197   : > { %v479_v9 = vpop.xlane.xlu1 %478  ;;  %v475_v10 = vpop.xlane.xlu0 %474 }
 0x19b   : > { %v481_v11 = vpop.xlane.xlu1 %480  ;;  %v477_v12 = vpop.xlane.xlu0 %476 }
 0x19c   : > { %v3174_v13 = vpack.c.bf16 %v477_v12, %v475_v10  ;;  %v3178_v14 = vpack.c.bf16 %v481_v11, %v479_v9 }
 0x19e   : > { %3175 = vmatprep.subr.bf16.mxu1 %v3174_v13 }
 0x19f   : > { %3177 = vmatpush3.bf16.msra.mxu1 %v3174_v13  ;;  %v485_v15 = vpop.xlane.xlu1 %484  ;;  %v483_v16 = vpop.xlane.xlu0 %482 }
 0x1a0   : > { %3179 = vmatprep.subr.bf16.mxu1 %v3178_v14  ;;  %v3182_v17 = vpack.c.bf16 %v485_v15, %v483_v16 }
 0x1a3   : > { %3181 = vmatpush3.bf16.msra.mxu1 %v3178_v14  ;;  %v489_v18 = vpop.xlane.xlu1 %488  ;;  %v487_v19 = vpop.xlane.xlu0 %486 }
 0x1a4   : > { %3183 = vmatprep.subr.bf16.mxu1 %v3182_v17  ;;  %v3186_v20 = vpack.c.bf16 %v489_v18, %v487_v19  ;;  %v1078_v19 = vld [vmem:[#allocation10 + $0x8] sm:$0xff] }
 0x1a7   : > { %3185 = vmatpush3.bf16.msra.mxu1 %v3182_v17 }
 0x1a8   : > { %3187 = vmatprep.subr.bf16.mxu1 %v3186_v20 }
 0x1ab   : > { %3189 = vmatpush3.bf16.msra.mxu1 %v3186_v20  ;;  %v1079_v20 = vld [vmem:[#allocation10 + $0x10] sm:$0xff] }
 0x1ae   : > { %2955 = vmatmul.mubr.msk.f32.vlgmr.msra.gmra.mrb[0].mxu1 %vm502_vm0, %v4388_v21 }
 0x1af   : > { %2957 = vmatprep.mubr.msk.f32.mxu1 %vm502_vm0, %v4390_v22 }
 0x1b2   : > { %2958 = vmatmul.mubr.msk.f32.gmra.mrb[2].mxu1 %vm502_vm0, %v4396_v23 }
 0x1b3   : > { %2968 = vmatprep.mubr.msk.f32.mxu1 %vm600_vm1, %v490_v24  ;;  %v1080_v24 = vld [vmem:[#allocation10 + $0x18] sm:$0xff] }
 0x281   : > { %v2956_v26 = vpop.f32.mrb[0].mxu1 }
 0x282   : > { %v581_v27 = vpop.f32.mrb[1].mxu1 }
 0x283   : > { %v3190_v28 = vpack.c.bf16 %v2956_v26, %v581_v27  ;;  %v1081_v26 = vld [vmem:[#allocation10 + $0x20] sm:$0xff]  ;;  %v1082_v27 = vld [vmem:[#allocation10 + $0x28] sm:$0xff] }
 0x285   : > { %v2959_v29 = vpop.f32.mrb[2].mxu1  ;;  %3191 = vmatprep.subr.bf16.mxu1 %v3190_v28 }
 0x286   : > { %v591_v30 = vpop.f32.mrb[3].mxu1  ;;  %3193 = vmatpush3.bf16.msra.mxu1 %v3190_v28 }
 0x287   : > { %v3194_v31 = vpack.c.bf16 %v2959_v29, %v591_v30 }
 0x289   : > { %3195 = vmatprep.subr.bf16.mxu1 %v3194_v31 }
 0x28a   : > { %3197 = vmatpush3.bf16.msra.mxu1 %v3194_v31 }
 0x28d   : > { %2969 = vmatmul.mubr.msk.f32.vlgmr.msra.gmra.mrb[4].mxu1 %vm600_vm1, %v4404_v32 }
 0x28e   : > { %2971 = vmatprep.mubr.msk.f32.mxu1 %vm600_vm1, %v4406_v33 }
 0x291   : > { %2972 = vmatmul.mubr.msk.f32.gmra.mrb[6].mxu1 %vm600_vm1, %v4412_v34 }
 0x292   : > { %2974 = vmatprep.mubr.msk.f32.mxu1 %vm600_vm1, %v4414_v35 }
 0x295   : > { %2975 = vmatmul.mubr.msk.f32.gmra.mrb[8].mxu1 %vm600_vm1, %v4420_v36 }
 0x296   : > { %2977 = vmatprep.mubr.msk.f32.mxu1 %vm600_vm1, %v4422_v37 }
 0x299   : > { %2978 = vmatmul.mubr.msk.f32.gmra.mrb[10].mxu1 %vm600_vm1, %v4428_v38 }
 0x29a   : > { %2996 = vmatprep.mubr.msk.f32.mxu1 %vm502_vm0, %v498_v8 }
 0x360   : > { %v2970_v39 = vpop.f32.mrb[4].mxu1 }
 0x361   : > { %737 = vperm.xlu1 %3384, %v2970_v39   ;;  %v691_v40 = vpop.f32.mrb[5].mxu1 }
 0x362   : > { %732 = vperm.xlu0 %3383, %v691_v40  }
 0x364   : > { %v2973_v41 = vpop.f32.mrb[6].mxu1 }
 0x365   : > { %747 = vperm.xlu1 %3384, %v2973_v41   ;;  %v701_v42 = vpop.f32.mrb[7].mxu1 }
 0x368   : > { %v2976_v43 = vpop.f32.mrb[8].mxu1 }
 0x369   : > { %742 = vperm.xlu1 %3384, %v701_v42   ;;  %v711_v44 = vpop.f32.mrb[9].mxu1 }
 0x36c   : > { %v2979_v45 = vpop.f32.mrb[10].mxu1 }
 0x36d   : > { %757 = vperm.xlu1 %3384, %v2976_v43   ;;  %v721_v46 = vpop.f32.mrb[11].mxu1 }
 0x371   : > { %752 = vperm.xlu1 %3384, %v711_v44  }
 0x375   : > { %762 = vperm.xlu1 %3384, %v721_v46  }
 0x379   : > { %767 = vperm.xlu1 %3384, %v2979_v45  }
 0x3e0   : > { %v738_v49 = vpop.permute.xlu1 %737 }
 0x3e1   : > { %v771_v50 = vsub.f32 %v4367_v3, %v738_v49  ;;  %v733_v51 = vpop.permute.xlu0 %732 }
 0x3e2   : > { %v770_v52 = vsub.f32 %v4359_v1, %v733_v51 }
 0x3e3   : > { %v4441_v53 = vsel %vm780_vm2, %v771_v50, 0.0 }
 0x3e4   : > { %v748_v54 = vpop.permute.xlu1 %747  ;;  %v792_v55 = vmul.f32 %v4441_v53, %v4441_v53  ;;  %v4447_v56 = vsel %vm780_vm2, %v770_v52, 0.0 }
 0x3e5   : > { %v773_v57 = vsub.f32 %v4364_v2, %v748_v54  ;;  %v791_v58 = vmul.f32 %v4447_v56, %v4447_v56 }
 0x3e6   : > { %801 = vadd.xlane.f32.xlu0 %v792_v55 }
 0x3e7   : > { %799 = vadd.xlane.f32.xlu1 %v791_v58  ;;  %v4454_v59 = vsel %vm780_vm2, %v773_v57, 0.0 }
 0x3e8   : > { %v743_v60 = vpop.permute.xlu1 %742  ;;  %v794_v61 = vmul.f32 %v4454_v59, %v4454_v59 }
 0x3e9   : > { %v772_v62 = vsub.f32 %v4356_v0, %v743_v60 }
 0x3eb   : > { %805 = vadd.xlane.f32.xlu1 %v794_v61  ;;  %v4461_v63 = vsel %vm780_vm2, %v772_v62, 0.0  ;;  %v1013_v61 = vld [vmem:[#allocation8] sm:$0xff] }
 0x3ec   : > { %v758_v1 = vpop.permute.xlu1 %757  ;;  %v793_v2 = vmul.f32 %v4461_v63, %v4461_v63 }
 0x3ed   : > { %v775_v3 = vsub.f32 %v4370_v4, %v758_v1 }
 0x3ee   : > { %803 = vadd.xlane.f32.xlu0 %v793_v2 }
 0x3ef   : > { %v4468_v8 = vsel %vm780_vm2, %v775_v3, 0.0 }
 0x3f0   : > { %v753_v9 = vpop.permute.xlu1 %752  ;;  %v796_v0 = vmul.f32 %v4468_v8, %v4468_v8 }
 0x3f1   : > { %v774_v10 = vsub.f32 %v4373_v5, %v753_v9 }
 0x3f2   : > { %809 = vadd.xlane.f32.xlu1 %v796_v0 }
 0x3f3   : > { %v4475_v11 = vsel %vm780_vm2, %v774_v10, 0.0 }
 0x3f4   : > { %v763_v12 = vpop.permute.xlu1 %762  ;;  %v795_v4 = vmul.f32 %v4475_v11, %v4475_v11 }
 0x3f5   : > { %v776_v13 = vsub.f32 %v4383_v7, %v763_v12  ;;  %v1077_v7 = vld [vmem:[#allocation10] sm:$0xff]  ;;  %v1016_v12 = vld [vmem:[#allocation8 + $0x18] sm:$0xff] }
 0x3f6   : > { %807 = vadd.xlane.f32.xlu0 %v795_v4  ;;  %v1015_v4 = vld [vmem:[#allocation8 + $0x10] sm:$0xff] }
 0x3f7   : > { %v4482_v14 = vsel %vm780_vm2, %v776_v13, 0.0 }
 0x3f8   : > { %v768_v15 = vpop.permute.xlu1 %767  ;;  %v797_v5 = vmul.f32 %v4482_v14, %v4482_v14 }
 0x3f9   : > { %v777_v16 = vsub.f32 %v4380_v6, %v768_v15 }
 0x3fa   : > { %811 = vadd.xlane.f32.xlu0 %v797_v5 }
 0x3fb   : > { %v4489_v17 = vsel %vm780_vm2, %v777_v16, 0.0 }
 0x3fc   : > { %v798_v18 = vmul.f32 %v4489_v17, %v4489_v17 }
 0x3fe   : > { %813 = vadd.xlane.f32.xlu1 %v798_v18  ;;  %v1018_v18 = vld [vmem:[#allocation8 + $0x28] sm:$0xff] }
 0x40f   : > { %1087 = vperm.xlu1 %3384, %v1077_v7   ;;  %v1017_v7 = vld [vmem:[#allocation8 + $0x20] sm:$0xff] }
 0x410   : > { %1092 = vperm.xlu0 %3383, %v1078_v19  }
 0x413   : > { %1097 = vperm.xlu1 %3384, %v1079_v20  }
 0x414   : > { %1102 = vperm.xlu0 %3383, %v1080_v24  }
 0x417   : > { %1107 = vperm.xlu1 %3384, %v1081_v26  }
 0x418   : > { %1112 = vperm.xlu0 %3383, %v1082_v27   ;;  %v1020_v27 = vld [vmem:[#allocation8 + $0x38] sm:$0xff] }
 0x473   : > { %v802_v6 = vpop.xlane.xlu0 %801 }
 0x474   : > { %v800_v28 = vpop.xlane.xlu1 %799 }
 0x475   : > { %v3198_v29 = vpack.c.bf16 %v802_v6, %v800_v28  ;;  %v1019_v6 = vld [vmem:[#allocation8 + $0x30] sm:$0xff] }
 0x477   : > { %3199 = vmatprep.subr.bf16.mxu1 %v3198_v29 }
 0x478   : > { %3201 = vmatpush3.bf16.msra.mxu1 %v3198_v29  ;;  %v806_v30 = vpop.xlane.xlu1 %805 }
 0x47b   : > { %v804_v31 = vpop.xlane.xlu0 %803 }
 0x47c   : > { %v3202_v39 = vpack.c.bf16 %v806_v30, %v804_v31 }
 0x47e   : > { %3203 = vmatprep.subr.bf16.mxu1 %v3202_v39 }
 0x47f   : > { %3205 = vmatpush3.bf16.msra.mxu1 %v3202_v39  ;;  %v810_v40 = vpop.xlane.xlu1 %809  ;;  %v1083_v39 = vld [vmem:[#allocation10 + $0x30] sm:$0xff] }
 0x483   : > { %v808_v41 = vpop.xlane.xlu0 %807 }
 0x484   : > { %v3206_v42 = vpack.c.bf16 %v810_v40, %v808_v41  ;;  %v1084_v40 = vld [vmem:[#allocation10 + $0x38] sm:$0xff]  ;;  %v3425_v41 = vld [vmem:[#allocation11] ss:$8 sps:$4 sm:$0xff]  }
 0x486   : > { %3207 = vmatprep.subr.bf16.mxu1 %v3206_v42 }
 0x487   : > { %3209 = vmatpush3.bf16.msra.mxu1 %v3206_v42  ;;  %v812_v43 = vpop.xlane.xlu0 %811  ;;  %v3427_v42 = vld [vmem:[#allocation11 + $0x4] ss:$8 sps:$4 sm:$0xff]  }
 0x48b   : > { %v814_v44 = vpop.xlane.xlu1 %813 }
 0x48c   : > { %v3210_v45 = vpack.c.bf16 %v814_v44, %v812_v43  ;;  %v3430_v43 = vld [vmem:[#allocation11 + $0x14] ss:$8 sps:$4 sm:$0xff]   ;;  %v3428_v44 = vld [vmem:[#allocation11 + $0x10] ss:$8 sps:$4 sm:$0xff]  }
 0x48e   : > { %3211 = vmatprep.subr.bf16.mxu1 %v3210_v45 }
 0x48f   : > { %3213 = vmatpush3.bf16.msra.mxu1 %v3210_v45  ;;  %v3433_v45 = vld [vmem:[#allocation11 + $0x24] ss:$8 sps:$4 sm:$0xff]  }
 0x492   : > { %2997 = vmatmul.mubr.msk.f32.vlgmr.msra.gmra.mrb[12].mxu1 %vm502_vm0, %v4388_v21 }
 0x493   : > { %2999 = vmatprep.mubr.msk.f32.mxu1 %vm502_vm0, %v4390_v22 }
 0x496   : > { %3000 = vmatmul.mubr.msk.f32.gmra.mrb[14].mxu1 %vm502_vm0, %v4396_v23 }
 0x565   : > { %v2998_v46 = vpop.f32.mrb[12].mxu1 }
 0x566   : > { %v881_v49 = vpop.f32.mrb[13].mxu1 }
 0x567   : > { %v3214_v50 = vpack.c.bf16 %v2998_v46, %v881_v49  ;;  %v3431_v46 = vld [vmem:[#allocation11 + $0x20] ss:$8 sps:$4 sm:$0xff]   ;;  %v3436_v49 = vld [vmem:[#allocation11 + $0x34] ss:$8 sps:$4 sm:$0xff]  }
 0x569   : > { %v3001_v51 = vpop.f32.mrb[14].mxu1  ;;  %3215 = vmatprep.subr.bf16.mxu0 %v3214_v50 }
 0x56a   : > { %v891_v52 = vpop.f32.mrb[15].mxu1  ;;  %3217 = vmatpush3.bf16.msra.mxu0 %v3214_v50  ;;  %v3434_v50 = vld [vmem:[#allocation11 + $0x30] ss:$8 sps:$4 sm:$0xff]  }
 0x56b   : > { %v3218_v54 = vpack.c.bf16 %v3001_v51, %v891_v52  ;;  %v1088_v51 = vpop.permute.xlu1 %1087  ;;  %v1093_v52 = vpop.permute.xlu0 %1092 }
 0x56d   : > { %3219 = vmatprep.subr.bf16.mxu0 %v3218_v54 }
 0x56e   : > { %3221 = vmatpush3.bf16.msra.mxu0 %v3218_v54 }
 0x56f   : > { %1237 = vmatprep.subr.bf16.mxu0 %v3427_v42  ;;  %v1098_v54 = vpop.permute.xlu1 %1097 }
 0x571   : > { %3011 = vmatmul.mubr.msk.f32.vlgmr.msra.gmra.mrb[0].mxu0 %vm600_vm1, %v4404_v32 }
 0x572   : > { %3013 = vmatprep.mubr.msk.f32.mxu0 %vm600_vm1, %v4406_v33  ;;  %1238 = vmatpush1.bf16.msra.mxu0 %v3425_v41 }
 0x573   : > { %1239 = vmatprep.subr.bf16.mxu0 %v3430_v43 }
 0x575   : > { %3014 = vmatmul.mubr.msk.f32.gmra.mrb[2].mxu0 %vm600_vm1, %v4412_v34 }
 0x576   : > { %3016 = vmatprep.mubr.msk.f32.mxu0 %vm600_vm1, %v4414_v35  ;;  %1240 = vmatpush1.bf16.msra.mxu0 %v3428_v44 }
 0x577   : > { %1241 = vmatprep.subr.bf16.mxu0 %v3433_v45 }
 0x579   : > { %3017 = vmatmul.mubr.msk.f32.gmra.mrb[4].mxu0 %vm600_vm1, %v4420_v36 }
 0x57a   : > { %3019 = vmatprep.mubr.msk.f32.mxu0 %vm600_vm1, %v4422_v37  ;;  %1242 = vmatpush1.bf16.msra.mxu0 %v3431_v46 }
 0x57b   : > { %1243 = vmatprep.subr.bf16.mxu0 %v3436_v49 }
 0x57d   : > { %3020 = vmatmul.mubr.msk.f32.gmra.mrb[6].mxu0 %vm600_vm1, %v4428_v38  ;;  %v1014_v38 = vld [vmem:[#allocation8 + $0x8] sm:$0xff] }
 0x57e   : > { %1269 = vmatprep.mubr.bf16.mxu0 %v3944_v25  ;;  %1244 = vmatpush1.bf16.msra.mxu0 %v3434_v50 }
 0x644   : > { %v3012_v21 = vpop.f32.mrb[0].mxu0 }
 0x645   : > { %v972_v22 = vadd.f32 1e-06, %v3012_v21  ;;  %v966_v23 = vpop.f32.mrb[1].mxu0  ;;  %v1103_v21 = vpop.permute.xlu0 %1102 }
 0x646   : > { %v967_v32 = vadd.f32 1e-06, %v966_v23 }
 0x647   : > { %3441 = vrsqrt.f32 %v972_v22  ;;  %v1108_v22 = vpop.permute.xlu1 %1107 }
 0x648   : > { %3443 = vrsqrt.f32 %v967_v32  ;;  %v3015_v33 = vpop.f32.mrb[2].mxu0 }
 0x649   : > { %v982_v34 = vadd.f32 1e-06, %v3015_v33  ;;  %v976_v35 = vpop.f32.mrb[3].mxu0  ;;  %v1113_v23 = vpop.permute.xlu0 %1112 }
 0x64a   : > { %v977_v55 = vadd.f32 1e-06, %v976_v35 }
 0x64b   : > { %3445 = vrsqrt.f32 %v982_v34 }
 0x64c   : > { %3447 = vrsqrt.f32 %v977_v55  ;;  %v3018_v36 = vpop.f32.mrb[4].mxu0 }
 0x64d   : > { %v992_v57 = vadd.f32 1e-06, %v3018_v36  ;;  %v986_v37 = vpop.f32.mrb[5].mxu0 }
 0x64e   : > { %v987_v58 = vadd.f32 1e-06, %v986_v37 }
 0x64f   : > { %3449 = vrsqrt.f32 %v992_v57 }
 0x650   : > { %3451 = vrsqrt.f32 %v987_v58  ;;  %v3021_v60 = vpop.f32.mrb[6].mxu0 }
 0x651   : > { %v3442_v62 = vpop.eup %3441  ;;  %v1002_v1 = vadd.f32 1e-06, %v3021_v60  ;;  %v996_v2 = vpop.f32.mrb[7].mxu0 }
 0x652   : > { %v3444_v3 = vpop.eup %3443  ;;  %v997_v9 = vadd.f32 1e-06, %v996_v2  ;;  %v1022_v0 = vmul.f32 %v3442_v62, %v1014_v38 }
 0x653   : > { %3453 = vrsqrt.f32 %v1002_v1  ;;  %v1021_v10 = vmul.f32 %v3444_v3, %v1013_v61 }
 0x654   : > { %3455 = vrsqrt.f32 %v997_v9  ;;  %1036 = vperm.xlu1 %3384, %v1022_v0  }
 0x655   : > { %v3446_v13 = vpop.eup %3445  ;;  %1031 = vperm.xlu0 %3383, %v1021_v10  }
 0x656   : > { %v3448_v15 = vpop.eup %3447  ;;  %v1024_v5 = vmul.f32 %v3446_v13, %v1016_v12 }
 0x657   : > { %v1023_v16 = vmul.f32 %v3448_v15, %v1015_v4 }
 0x659   : > { %v3450_v19 = vpop.eup %3449  ;;  %1041 = vperm.xlu1 %3384, %v1023_v16   ;;  %1046 = vperm.xlu0 %3383, %v1024_v5  }
 0x65a   : > { %v3452_v20 = vpop.eup %3451  ;;  %v1026_v24 = vmul.f32 %v3450_v19, %v1018_v18 }
 0x65b   : > { %v1025_v26 = vmul.f32 %v3452_v20, %v1017_v7 }
 0x65d   : > { %v3454_v28 = vpop.eup %3453  ;;  %1051 = vperm.xlu1 %3384, %v1025_v26   ;;  %1056 = vperm.xlu0 %3383, %v1026_v24   ;;  %v1148_v26 = vshrl.u32 %v778_v47, 7 }
 0x65e   : > { %v3456_v29 = vpop.eup %3455  ;;  %v1028_v30 = vmul.f32 %v3454_v28, %v1020_v27 }
 0x65f   : > { %v1027_v31 = vmul.f32 %v3456_v29, %v1019_v6  ;;  %v1149_v27 = vsub.s32 0, %v1148_v26  ;;  %v1145_v6 = vld [vmem:[#allocation13] sm:$0x3]  ;;  %v1153_v28 = vsub.s32 1, %v1148_v26 }
 0x661   : > { %1061 = vperm.xlu1 %3384, %v1027_v31   ;;  %1066 = vperm.xlu0 %3383, %v1028_v30   ;;  %v4538_v29 = vrot.slane %v1145_v6, %v1149_v27  ;;  %v4540_v31 = vrot.slane %v1145_v6, %v1153_v28 }
 0x665   : > { %1117 = vperm.xlu1 %3384, %v1083_v39   ;;  %1122 = vperm.xlu0 %3383, %v1084_v40  }
 0x6d3   : > { %v1037_v32 = vpop.permute.xlu1 %1036 }
 0x6d4   : > { %v1070_v33 = vmul.f32 %v1037_v32, %v4441_v53  ;;  %v1032_v34 = vpop.permute.xlu0 %1031 }
 0x6d5   : > { %v1069_v35 = vmul.f32 %v1032_v34, %v4447_v56 }
 0x6d6   : > { %v1126_v55 = vadd.f32 %v1093_v52, %v1070_v33 }
 0x6d7   : > { %v1125_v36 = vadd.f32 %v1088_v51, %v1069_v35 }
 0x6d8   : > { %v1047_v57 = vpop.permute.xlu0 %1046  ;;  %v1042_v37 = vpop.permute.xlu1 %1041 }
 0x6d9   : > { %v1072_v58 = vmul.f32 %v1047_v57, %v4454_v59  ;;  %v1071_v38 = vmul.f32 %v1042_v37, %v4461_v63  ;;  %v1133_v60 = vpack.c.bf16 %v1126_v55, %v1125_v36 }
 0x6db   : > { %v1128_v61 = vadd.f32 %v1103_v21, %v1072_v58  ;;  %v1127_v62 = vadd.f32 %v1098_v54, %v1071_v38  ;;  %1157 = vxpose.xlu1.c.b16.start [1/4] (short) %v1133_v60, 128 }
 0x6dc   : > { %v1057_v1 = vpop.permute.xlu0 %1056  ;;  %v1052_v2 = vpop.permute.xlu1 %1051 }
 0x6dd   : > { %v1134_v3 = vpack.c.bf16 %v1128_v61, %v1127_v62  ;;  %v1074_v53 = vmul.f32 %v1057_v1, %v4468_v8  ;;  %v1073_v9 = vmul.f32 %v1052_v2, %v4475_v11 }
 0x6df   : > { %v1130_v56 = vadd.f32 %v1113_v23, %v1074_v53  ;;  %v1129_v0 = vadd.f32 %v1108_v22, %v1073_v9  ;;  %1158 = vxpose.xlu1.c.b16.cont [2/4] (short) %v1134_v3, 128 }
 0x6e0   : > { %v1067_v10 = vpop.permute.xlu0 %1066  ;;  %v1062_v12 = vpop.permute.xlu1 %1061 }
 0x6e1   : > { %v1135_v4 = vpack.c.bf16 %v1130_v56, %v1129_v0  ;;  %v1076_v59 = vmul.f32 %v1067_v10, %v4489_v17  ;;  %v1075_v63 = vmul.f32 %v1062_v12, %v4482_v14 }
 0x6e3   : > { %1159 = vxpose.xlu1.c.b16.cont [3/4] (short) %v1135_v4, 128 }
 0x6e4   : > { %v1123_v13 = vpop.permute.xlu0 %1122  ;;  %v1118_v15 = vpop.permute.xlu1 %1117 }
 0x6e5   : > { %v1132_v5 = vadd.f32 %v1123_v13, %v1076_v59  ;;  %v1131_v16 = vadd.f32 %v1118_v15, %v1075_v63 }
 0x6e7   : > { %v1136_v18 = vpack.c.bf16 %v1132_v5, %v1131_v16 }
 0x6e9   : > { %1160 = vxpose.xlu1.c.b16.end [4/4] (short) %v1136_v18, 128 }
 0x743   : > { %v1165_v8 = vpop.trf.xlu1 }
 0x744   : > { %2775 = vmatmul.mubr.msk.bf16.vlgmr.msra.gmra.mrb[8].mxu0 %vm502_vm0, %v1165_v8 }
 0x745   : > { %1279 = vmatprep.mubr.bf16.mxu0 %v3944_v25 }
 0x747   : > { %v1166_v11 = vpop.trf.xlu1 }
 0x74b   : > { %v1167_v17 = vpop.trf.xlu1 }
 0x74c   : > { %2776 = vmatmul.mubr.msk.bf16.gmra.mrb[12].mxu0 %vm502_vm0, %v1166_v11 }
 0x74d   : > { %1289 = vmatprep.mubr.bf16.mxu0 %v3944_v25 }
 0x74f   : > { %v1168_v14 = vpop.trf.xlu1 }
 0x753   : > { %v1169_v7 = vpop.trf.xlu1 }
 0x754   : > { %2777 = vmatmul.mubr.msk.bf16.gmra.mrb[16].mxu0 %vm502_vm0, %v1167_v17 }
 0x755   : > { %1299 = vmatprep.mubr.bf16.mxu0 %v3944_v25 }
 0x757   : > { %v1170_v19 = vpop.trf.xlu1 }
 0x75b   : > { %v1171_v20 = vpop.trf.xlu1 }
 0x75c   : > { %2778 = vmatmul.mubr.msk.bf16.gmra.mrb[20].mxu0 %vm502_vm0, %v1168_v14 }
 0x75d   : > { %1309 = vmatprep.mubr.bf16.mxu0 %v3944_v25 }
 0x75f   : > { %v1172_v24 = vpop.trf.xlu1 }
 0x764   : > { %2779 = vmatmul.mubr.msk.bf16.gmra.mrb[24].mxu0 %vm502_vm0, %v1169_v7 }
 0x765   : > { %1319 = vmatprep.mubr.bf16.mxu0 %v3944_v25 }
 0x76c   : > { %2780 = vmatmul.mubr.msk.bf16.gmra.mrb[28].mxu0 %vm502_vm0, %v1170_v19 }
 0x76d   : > { %1329 = vmatprep.mubr.bf16.mxu0 %v3944_v25 }
 0x774   : > { %2781 = vmatmul.mubr.msk.bf16.gmra.mrb[32].mxu0 %vm502_vm0, %v1171_v20 }
 0x775   : > { %1339 = vmatprep.mubr.bf16.mxu0 %v3944_v25 }
 0x77c   : > { %2782 = vmatmul.mubr.msk.bf16.gmra.mrb[36].mxu0 %vm502_vm0, %v1172_v24 }
 0x817   : > { %v1271_v30 = vpop.f32.mrb[8].mxu0 }
 0x818   : > { %v1273_v39 = vpop.f32.mrb[9].mxu0  ;;  %v1272_v41 = vadd.f32 %v1271_v30, %v4538_v29 }
 0x819   : > { %v1275_v40 = vpop.f32.mrb[10].mxu0  ;;  %v1274_v43 = vadd.f32 %v1273_v39, %v4540_v31 }
 0x81a   : > { %v1276_v42 = vadd.f32 %v1275_v40, %v4538_v29  ;;  %v1277_v25 = vpop.f32.mrb[11].mxu0 }
 0x81b   : > { %v1278_v44 = vadd.f32 %v1277_v25, %v4540_v31 }
 0x81c   : > { %v4546_v47 = vpack.c.bf16 %v1276_v42, %v1272_v41 }
 0x81d   : > { %v4548_v45 = vpack.c.bf16 %v1278_v44, %v1274_v43 }
 0x81e   : > { %1374 = vrot.lane.b32.xlu0 %v4546_v47, %s3945_s2  ;;  %3038 = vmatprep.mubr.msk.bf16.mxu1 %vm600_vm1, %v4546_v47 }
 0x81f   : > { %v1281_v46 = vpop.f32.mrb[12].mxu0  ;;  %3054 = vmatprep.subr.bf16.mxu0 %v4548_v45 }
 0x820   : > { %v1283_v49 = vpop.f32.mrb[13].mxu0  ;;  %3055 = vmatpush3.bf16.msra.mxu0 %v4548_v45  ;;  %v1282_v51 = vadd.f32 %v1281_v46, %v4538_v29 }
 0x821   : > { %v1285_v50 = vpop.f32.mrb[14].mxu0  ;;  %v1284_v21 = vadd.f32 %v1283_v49, %v4540_v31 }
 0x822   : > { %v1286_v52 = vadd.f32 %v1285_v50, %v4538_v29  ;;  %v1287_v54 = vpop.f32.mrb[15].mxu0 }
 0x823   : > { %v1288_v22 = vadd.f32 %v1287_v54, %v4540_v31 }
 0x824   : > { %v4560_v23 = vpack.c.bf16 %v1286_v52, %v1282_v51 }
 0x825   : > { %v4562_v32 = vpack.c.bf16 %v1288_v22, %v1284_v21 }
 0x826   : > { %1376 = vrot.lane.b32.xlu0 %v4560_v23, %s3945_s2 }
 0x827   : > { %v1291_v33 = vpop.f32.mrb[16].mxu0  ;;  %3056 = vmatprep.subr.bf16.mxu0 %v4562_v32 }
 0x828   : > { %v1293_v34 = vpop.f32.mrb[17].mxu0  ;;  %3057 = vmatpush3.bf16.msra.mxu0 %v4562_v32  ;;  %v1292_v55 = vadd.f32 %v1291_v33, %v4538_v29 }
 0x829   : > { %v1295_v35 = vpop.f32.mrb[18].mxu0  ;;  %v1294_v37 = vadd.f32 %v1293_v34, %v4540_v31 }
 0x82a   : > { %v1296_v36 = vadd.f32 %v1295_v35, %v4538_v29  ;;  %v1297_v57 = vpop.f32.mrb[19].mxu0 }
 0x82b   : > { %v1298_v58 = vadd.f32 %v1297_v57, %v4540_v31 }
 0x82c   : > { %v4572_v38 = vpack.c.bf16 %v1296_v36, %v1292_v55 }
 0x82d   : > { %v4574_v60 = vpack.c.bf16 %v1298_v58, %v1294_v37 }
 0x82e   : > { %1378 = vrot.lane.b32.xlu0 %v4572_v38, %s3945_s2 }
 0x82f   : > { %v1301_v61 = vpop.f32.mrb[20].mxu0  ;;  %3058 = vmatprep.subr.bf16.mxu0 %v4574_v60 }
 0x830   : > { %v1303_v62 = vpop.f32.mrb[21].mxu0  ;;  %3059 = vmatpush3.bf16.msra.mxu0 %v4574_v60  ;;  %v1302_v2 = vadd.f32 %v1301_v61, %v4538_v29 }
 0x831   : > { %v1305_v1 = vpop.f32.mrb[22].mxu0  ;;  %v1304_v9 = vadd.f32 %v1303_v62, %v4540_v31 }
 0x832   : > { %v1306_v3 = vadd.f32 %v1305_v1, %v4538_v29  ;;  %v1307_v53 = vpop.f32.mrb[23].mxu0 }
 0x833   : > { %v1308_v56 = vadd.f32 %v1307_v53, %v4540_v31 }
 0x834   : > { %v4584_v0 = vpack.c.bf16 %v1306_v3, %v1302_v2 }
 0x835   : > { %v4586_v10 = vpack.c.bf16 %v1308_v56, %v1304_v9 }
 0x836   : > { %1380 = vrot.lane.b32.xlu0 %v4584_v0, %s3945_s2 }
 0x837   : > { %v1311_v12 = vpop.f32.mrb[24].mxu0  ;;  %3060 = vmatprep.subr.bf16.mxu0 %v4586_v10 }
 0x838   : > { %v1313_v4 = vpop.f32.mrb[25].mxu0  ;;  %3061 = vmatpush3.bf16.msra.mxu0 %v4586_v10  ;;  %v1312_v63 = vadd.f32 %v1311_v12, %v4538_v29 }
 0x839   : > { %v1315_v59 = vpop.f32.mrb[26].mxu0  ;;  %v1314_v5 = vadd.f32 %v1313_v4, %v4540_v31 }
 0x83a   : > { %v1316_v13 = vadd.f32 %v1315_v59, %v4538_v29  ;;  %v1317_v15 = vpop.f32.mrb[27].mxu0 }
 0x83b   : > { %v1318_v16 = vadd.f32 %v1317_v15, %v4540_v31 }
 0x83c   : > { %v4596_v18 = vpack.c.bf16 %v1316_v13, %v1312_v63 }
 0x83d   : > { %v4598_v8 = vpack.c.bf16 %v1318_v16, %v1314_v5 }
 0x83e   : > { %1824 = vrot.lane.b32.xlu1 %v4596_v18, %s3946_s16  ;;  %1382 = vrot.lane.b32.xlu0 %v4596_v18, %s3945_s2 }
 0x83f   : > { %v1321_v11 = vpop.f32.mrb[28].mxu0  ;;  %3062 = vmatprep.subr.bf16.mxu0 %v4598_v8 }
 0x840   : > { %v1323_v17 = vpop.f32.mrb[29].mxu0  ;;  %3063 = vmatpush3.bf16.msra.mxu0 %v4598_v8  ;;  %v1322_v7 = vadd.f32 %v1321_v11, %v4538_v29 }
 0x841   : > { %v1325_v14 = vpop.f32.mrb[30].mxu0  ;;  %v1324_v24 = vadd.f32 %v1323_v17, %v4540_v31 }
 0x842   : > { %v1326_v19 = vadd.f32 %v1325_v14, %v4538_v29  ;;  %1804 = vrot.lane.b32.xlu1 %v4572_v38, %s3947_s17  ;;  %v1327_v20 = vpop.f32.mrb[31].mxu0 }
 0x843   : > { %v1328_v26 = vadd.f32 %v1327_v20, %v4540_v31 }
 0x844   : > { %v4612_v27 = vpack.c.bf16 %v1326_v19, %v1322_v7 }
 0x845   : > { %v4614_v6 = vpack.c.bf16 %v1328_v26, %v1324_v24 }
 0x846   : > { %1808 = vrot.lane.b32.xlu1 %v4596_v18, %s3947_s17  ;;  %1384 = vrot.lane.b32.xlu0 %v4612_v27, %s3945_s2 }
 0x847   : > { %v1331_v28 = vpop.f32.mrb[32].mxu0  ;;  %3064 = vmatprep.subr.bf16.mxu0 %v4614_v6 }
 0x848   : > { %v1333_v30 = vpop.f32.mrb[33].mxu0  ;;  %3065 = vmatpush3.bf16.msra.mxu0 %v4614_v6  ;;  %v1332_v40 = vadd.f32 %v1331_v28, %v4538_v29 }
 0x849   : > { %v1335_v39 = vpop.f32.mrb[34].mxu0  ;;  %v1334_v25 = vadd.f32 %v1333_v30, %v4540_v31 }
 0x84a   : > { %v1336_v41 = vadd.f32 %v1335_v39, %v4538_v29  ;;  %v1337_v42 = vpop.f32.mrb[35].mxu0 }
 0x84b   : > { %v1338_v43 = vadd.f32 %v1337_v42, %v4540_v31 }
 0x84c   : > { %v4626_v44 = vpack.c.bf16 %v1336_v41, %v1332_v40 }
 0x84d   : > { %v4628_v46 = vpack.c.bf16 %v1338_v43, %v1334_v25 }
 0x84e   : > { %1812 = vrot.lane.b32.xlu1 %v4626_v44, %s3947_s17  ;;  %1386 = vrot.lane.b32.xlu0 %v4626_v44, %s3945_s2 }
 0x84f   : > { %v1341_v49 = vpop.f32.mrb[36].mxu0  ;;  %3066 = vmatprep.subr.bf16.mxu0 %v4628_v46 }
 0x850   : > { %v1343_v50 = vpop.f32.mrb[37].mxu0  ;;  %3067 = vmatpush3.bf16.msra.mxu0 %v4628_v46  ;;  %v1342_v52 = vadd.f32 %v1341_v49, %v4538_v29 }
 0x851   : > { %v1345_v51 = vpop.f32.mrb[38].mxu0  ;;  %v1344_v22 = vadd.f32 %v1343_v50, %v4540_v31 }
 0x852   : > { %v1346_v54 = vadd.f32 %v1345_v51, %v4538_v29  ;;  %2123 = vrot.lane.b32.xlu1 %v4562_v32, %s3947_s17  ;;  %v1347_v21 = vpop.f32.mrb[39].mxu0 }
 0x853   : > { %v1348_v33 = vadd.f32 %v1347_v21, %v4540_v31 }
 0x854   : > { %v4642_v34 = vpack.c.bf16 %v1346_v54, %v1342_v52 }
 0x855   : > { %v4644_v35 = vpack.c.bf16 %v1348_v33, %v1344_v22 }
 0x856   : > { %1388 = vrot.lane.b32.xlu0 %v4642_v34, %s3945_s2  ;;  %s3853_s2 = scalar_lea.vmem %s3852_s19, 2048 }
 0x857   : > { %3068 = vmatprep.subr.bf16.mxu0 %v4644_v35  ;;  %p3855_p8 = scmp.lt.s32.totalorder %s3853_s2, %s3847_s24 }
 0x858   : > { %3069 = vmatpush3.bf16.msra.mxu0 %v4644_v35 }
 0x859   : > { %p3856_p4 = por %p3855_p8, %p3854_p2 }
 0x85a   : > { %1816 = vrot.lane.b32.xlu0 %v4546_v47, %s3946_s16 }
 0x85b   : > { %p3857_p10 = pnand %p3856_p4, %p3850_p0 }
 0x85e   : > { %1818 = vrot.lane.b32.xlu0 %v4560_v23, %s3946_s16 }
 0x862   : > { %1820 = vrot.lane.b32.xlu0 %v4572_v38, %s3946_s16 }
 0x866   : > { %1822 = vrot.lane.b32.xlu0 %v4584_v0, %s3946_s16 }
 0x86a   : > { %1826 = vrot.lane.b32.xlu0 %v4612_v27, %s3946_s16 }
 0x86e   : > { %1828 = vrot.lane.b32.xlu0 %v4626_v44, %s3946_s16 }
 0x872   : > { %1830 = vrot.lane.b32.xlu0 %v4642_v34, %s3946_s16 }
 0x876   : > { %1800 = vrot.lane.b32.xlu0 %v4546_v47, %s3947_s17 }
 0x87a   : > { %1802 = vrot.lane.b32.xlu0 %v4560_v23, %s3947_s17 }
 0x87e   : > { %1806 = vrot.lane.b32.xlu0 %v4584_v0, %s3947_s17 }
 0x882   : > { %1810 = vrot.lane.b32.xlu0 %v4612_v27, %s3947_s17 }
 0x886   : > { %1814 = vrot.lane.b32.xlu0 %v4642_v34, %s3947_s17 }
 0x88a   : > { %2121 = vrot.lane.b32.xlu0 %v4548_v45, %s3947_s17 }
 0x88e   : > { %2125 = vrot.lane.b32.xlu0 %v4574_v60, %s3947_s17 }
 0x890   : > { %v1375_v29 = vpop.permute.xlu0 %1374 }
 0x891   : > { %3222 = vmatprep.subr.msk.bf16.mxu1 %vm600_vm1, %v1375_v29  ;;  %v1415_v31 = vsel %vm600_vm1, %v1375_v29, 0 }
 0x892   : > { %3023 = vmatpush3.bf16.xpose.msra.mxu1 %v1415_v31  ;;  %2127 = vrot.lane.b32.xlu0 %v4586_v10, %s3947_s17 }
 0x896   : > { %2129 = vrot.lane.b32.xlu0 %v4598_v8, %s3947_s17 }
 0x898   : > { %v1377_v47 = vpop.permute.xlu0 %1376 }
 0x899   : > { %3223 = vmatprep.subr.msk.bf16.mxu1 %vm600_vm1, %v1377_v47  ;;  %v1418_v45 = vsel %vm600_vm1, %v1377_v47, 0 }
 0x89a   : > { %3025 = vmatpush3.bf16.xpose.msra.mxu1 %v1418_v45 }
 0x8a0   : > { %v1379_v32 = vpop.permute.xlu0 %1378 }
 0x8a1   : > { %3224 = vmatprep.subr.msk.bf16.mxu1 %vm600_vm1, %v1379_v32  ;;  %v1421_v55 = vsel %vm600_vm1, %v1379_v32, 0 }
 0x8a2   : > { %3027 = vmatpush3.bf16.xpose.msra.mxu1 %v1421_v55 }
 0x8a8   : > { %v1381_v36 = vpop.permute.xlu0 %1380 }
 0x8a9   : > { %3225 = vmatprep.subr.msk.bf16.mxu1 %vm600_vm1, %v1381_v36  ;;  %v1424_v57 = vsel %vm600_vm1, %v1381_v36, 0 }
 0x8aa   : > { %3029 = vmatpush3.bf16.xpose.msra.mxu1 %v1424_v57 }
 0x8b0   : > { %v1383_v37 = vpop.permute.xlu0 %1382  ;;  %v1825_v15 = vpop.permute.xlu1 %1824 }
 0x8b1   : > { %3226 = vmatprep.subr.msk.bf16.mxu1 %vm600_vm1, %v1383_v37  ;;  %v1427_v58 = vsel %vm600_vm1, %v1383_v37, 0 }
 0x8b2   : > { %3031 = vmatpush3.bf16.xpose.msra.mxu1 %v1427_v58 }
 0x8b4   : > { %v1805_v20 = vpop.permute.xlu1 %1804 }
 0x8b8   : > { %v1385_v60 = vpop.permute.xlu0 %1384  ;;  %v1809_v24 = vpop.permute.xlu1 %1808 }
 0x8b9   : > { %3227 = vmatprep.subr.msk.bf16.mxu1 %vm600_vm1, %v1385_v60  ;;  %v1430_v61 = vsel %vm600_vm1, %v1385_v60, 0 }
 0x8ba   : > { %3033 = vmatpush3.bf16.xpose.msra.mxu1 %v1430_v61 }
 0x8c0   : > { %v1387_v62 = vpop.permute.xlu0 %1386  ;;  %v1813_v26 = vpop.permute.xlu1 %1812 }
 0x8c1   : > { %3228 = vmatprep.subr.msk.bf16.mxu1 %vm600_vm1, %v1387_v62  ;;  %v1433_v1 = vsel %vm600_vm1, %v1387_v62, 0 }
 0x8c2   : > { %3035 = vmatpush3.bf16.xpose.msra.mxu1 %v1433_v1 }
 0x8c8   : > { %v1389_v2 = vpop.permute.xlu0 %1388 }
 0x8c9   : > { %3229 = vmatprep.subr.msk.bf16.mxu1 %vm600_vm1, %v1389_v2  ;;  %v1436_v3 = vsel %vm600_vm1, %v1389_v2, 0 }
 0x8ca   : > { %3037 = vmatpush3.bf16.xpose.msra.mxu1 %v1436_v3 }
 0x8cc   : > { %v1817_v53 = vpop.permute.xlu0 %1816 }
 0x8cd   : > { %3230 = vmatprep.subr.msk.bf16.mxu1 %vm600_vm1, %v1817_v53  ;;  %v1857_v56 = vsel %vm600_vm1, %v1817_v53, 0 }
 0x8d0   : > { %v1819_v9 = vpop.permute.xlu0 %1818 }
 0x8d1   : > { %3039 = vmatmul.mubr.msk.bf16.vlgmr.msra.gmra.mrb[16].mxu1 %vm600_vm1, %v4560_v23  ;;  %v1860_v4 = vsel %vm600_vm1, %v1819_v9, 0 }
 0x8d2   : > { %3042 = vmatprep.mubr.msk.bf16.mxu1 %vm600_vm1, %v4572_v38  ;;  %3087 = vmatpush3.bf16.xpose.msra.mxu1 %v1857_v56 }
 0x8d3   : > { %3231 = vmatprep.subr.msk.bf16.mxu1 %vm600_vm1, %v1819_v9 }
 0x8d4   : > { %v1821_v10 = vpop.permute.xlu0 %1820 }
 0x8d5   : > { %v1863_v38 = vsel %vm600_vm1, %v1821_v10, 0 }
 0x8d8   : > { %v1823_v12 = vpop.permute.xlu0 %1822 }
 0x8d9   : > { %3043 = vmatmul.mubr.msk.bf16.gmra.mrb[20].mxu1 %vm600_vm1, %v4584_v0  ;;  %v1866_v13 = vsel %vm600_vm1, %v1823_v12, 0 }
 0x8da   : > { %3046 = vmatprep.mubr.msk.bf16.mxu1 %vm600_vm1, %v4596_v18  ;;  %3089 = vmatpush3.bf16.xpose.msra.mxu1 %v1860_v4  ;;  %v1869_v18 = vsel %vm600_vm1, %v1825_v15, 0 }
 0x8db   : > { %3232 = vmatprep.subr.msk.bf16.mxu1 %vm600_vm1, %v1821_v10 }
 0x8dc   : > { %v1827_v23 = vpop.permute.xlu0 %1826 }
 0x8dd   : > { %v1872_v17 = vsel %vm600_vm1, %v1827_v23, 0 }
 0x8e0   : > { %v1829_v59 = vpop.permute.xlu0 %1828 }
 0x8e1   : > { %3047 = vmatmul.mubr.msk.bf16.gmra.mrb[24].mxu1 %vm600_vm1, %v4612_v27  ;;  %v1875_v7 = vsel %vm600_vm1, %v1829_v59, 0 }
 0x8e2   : > { %3050 = vmatprep.mubr.msk.bf16.mxu1 %vm600_vm1, %v4626_v44  ;;  %3091 = vmatpush3.bf16.xpose.msra.mxu1 %v1863_v38 }
 0x8e3   : > { %3233 = vmatprep.subr.msk.bf16.mxu1 %vm600_vm1, %v1823_v12 }
 0x8e4   : > { %v1831_v0 = vpop.permute.xlu0 %1830 }
 0x8e5   : > { %v1878_v19 = vsel %vm600_vm1, %v1831_v0, 0 }
 0x8e8   : > { %v1801_v63 = vpop.permute.xlu0 %1800 }
 0x8e9   : > { %3051 = vmatmul.mubr.msk.bf16.gmra.mrb[28].mxu1 %vm600_vm1, %v4642_v34 }
 0x8ea   : > { %3093 = vmatpush3.bf16.xpose.msra.mxu1 %v1866_v13  ;;  %3102 = vmatprep.mubr.msk.bf16.mxu1 %vm600_vm1, %v1801_v63 }
 0x8eb   : > { %3234 = vmatprep.subr.msk.bf16.mxu1 %vm600_vm1, %v1825_v15 }
 0x8ec   : > { %v1803_v5 = vpop.permute.xlu0 %1802 }
 0x8f0   : > { %v1807_v16 = vpop.permute.xlu0 %1806 }
 0x8f2   : > { %3095 = vmatpush3.bf16.xpose.msra.mxu1 %v1869_v18 }
 0x8f3   : > { %3235 = vmatprep.subr.msk.bf16.mxu1 %vm600_vm1, %v1827_v23 }
 0x8f4   : > { %v1811_v8 = vpop.permute.xlu0 %1810 }
 0x8f8   : > { %v1815_v11 = vpop.permute.xlu0 %1814 }
 0x8fa   : > { %3097 = vmatpush3.bf16.xpose.msra.mxu1 %v1872_v17 }
 0x8fb   : > { %3236 = vmatprep.subr.msk.bf16.mxu1 %vm600_vm1, %v1829_v59 }
 0x8fc   : > { %v4726_v14 = vpop.permute.xlu0 %2121 }
 0x8fd   : > { %3118 = vmatprep.subr.bf16.mxu0 %v4726_v14 }
 0x902   : > { %3099 = vmatpush3.bf16.xpose.msra.mxu1 %v1875_v7 }
 0x903   : > { %3237 = vmatprep.subr.msk.bf16.mxu1 %vm600_vm1, %v1831_v0 }
 0x90a   : > { %3101 = vmatpush3.bf16.xpose.msra.mxu1 %v1878_v19 }
 0x911   : > { %3103 = vmatmul.mubr.msk.bf16.vlgmr.msra.gmra.mrb[32].mxu1 %vm600_vm1, %v1803_v5 }
 0x912   : > { %3106 = vmatprep.mubr.msk.bf16.mxu1 %vm600_vm1, %v1805_v20  ;;  %v4871_v20 = vpop.permute.xlu0 %2125 }
 0x919   : > { %3107 = vmatmul.mubr.msk.bf16.gmra.mrb[36].mxu1 %vm600_vm1, %v1807_v16 }
 0x91a   : > { %3110 = vmatprep.mubr.msk.bf16.mxu1 %vm600_vm1, %v1809_v24  ;;  %v4873_v24 = vpop.permute.xlu0 %2127 }
 0x921   : > { %3111 = vmatmul.mubr.msk.bf16.gmra.mrb[40].mxu1 %vm600_vm1, %v1811_v8 }
 0x922   : > { %3114 = vmatprep.mubr.msk.bf16.mxu1 %vm600_vm1, %v1813_v26  ;;  %v4879_v26 = vpop.permute.xlu0 %2129 }
 0x929   : > { %3115 = vmatmul.mubr.msk.bf16.gmra.mrb[44].mxu1 %vm600_vm1, %v1815_v11 }
 0x9a4   : > { %v3040_v27 = vpop.f32.mrb[16].mxu1 }
 0x9a5   : > { %v1472_v28 = vpop.f32.mrb[17].mxu1  ;;  %v4741_v30 = vsel %vm780_vm2, %v3040_v27, -1e+30  ;;  %v4882_v27 = vpop.permute.xlu1 %2123 }
 0x9a6   : > { %1555 = vmax.xlane.f32.xlu0 %v4741_v30  ;;  %v3041_v39 = vpop.f32.mrb[18].mxu1  ;;  %v4746_v40 = vsel %vm780_vm2, %v1472_v28, -1e+30 }
 0x9a7   : > { %1551 = vmax.xlane.f32.xlu1 %v4746_v40  ;;  %v1475_v41 = vpop.f32.mrb[19].mxu1  ;;  %v4756_v25 = vsel %vm780_vm2, %v3041_v39, -1e+30 }
 0x9a8   : > { %v4751_v42 = vsel %vm780_vm2, %v1475_v41, -1e+30 }
 0x9aa   : > { %1553 = vmax.xlane.f32.xlu0 %v4751_v42 }
 0x9ab   : > { %1557 = vmax.xlane.f32.xlu1 %v4756_v25 }
 0x9ac   : > { %v3044_v43 = vpop.f32.mrb[20].mxu1 }
 0x9ad   : > { %v1488_v44 = vpop.f32.mrb[21].mxu1  ;;  %v4761_v49 = vsel %vm780_vm2, %v3044_v43, -1e+30 }
 0x9ae   : > { %1563 = vmax.xlane.f32.xlu0 %v4761_v49  ;;  %v3045_v50 = vpop.f32.mrb[22].mxu1  ;;  %v4771_v54 = vsel %vm780_vm2, %v1488_v44, -1e+30 }
 0x9af   : > { %v1491_v51 = vpop.f32.mrb[23].mxu1  ;;  %v4766_v52 = vsel %vm780_vm2, %v3045_v50, -1e+30 }
 0x9b0   : > { %1565 = vmax.xlane.f32.xlu1 %v4766_v52  ;;  %v4776_v21 = vsel %vm780_vm2, %v1491_v51, -1e+30 }
 0x9b2   : > { %1559 = vmax.xlane.f32.xlu0 %v4771_v54 }
 0x9b4   : > { %1561 = vmax.xlane.f32.xlu1 %v4776_v21  ;;  %v3048_v22 = vpop.f32.mrb[24].mxu1 }
 0x9b5   : > { %v1504_v33 = vpop.f32.mrb[25].mxu1  ;;  %v4781_v34 = vsel %vm780_vm2, %v3048_v22, -1e+30 }
 0x9b6   : > { %1571 = vmax.xlane.f32.xlu0 %v4781_v34  ;;  %v3049_v29 = vpop.f32.mrb[26].mxu1  ;;  %v4791_v45 = vsel %vm780_vm2, %v1504_v33, -1e+30 }
 0x9b7   : > { %v1507_v31 = vpop.f32.mrb[27].mxu1  ;;  %v4786_v47 = vsel %vm780_vm2, %v3049_v29, -1e+30 }
 0x9b8   : > { %1573 = vmax.xlane.f32.xlu1 %v4786_v47  ;;  %v4796_v32 = vsel %vm780_vm2, %v1507_v31, -1e+30 }
 0x9ba   : > { %1567 = vmax.xlane.f32.xlu0 %v4791_v45 }
 0x9bc   : > { %1569 = vmax.xlane.f32.xlu1 %v4796_v32  ;;  %v3052_v55 = vpop.f32.mrb[28].mxu1 }
 0x9bd   : > { %v1520_v36 = vpop.f32.mrb[29].mxu1  ;;  %v4801_v57 = vsel %vm780_vm2, %v3052_v55, -1e+30 }
 0x9be   : > { %1579 = vmax.xlane.f32.xlu0 %v4801_v57  ;;  %v3053_v37 = vpop.f32.mrb[30].mxu1  ;;  %v4811_v61 = vsel %vm780_vm2, %v1520_v36, -1e+30 }
 0x9bf   : > { %v1523_v58 = vpop.f32.mrb[31].mxu1  ;;  %v4806_v60 = vsel %vm780_vm2, %v3053_v37, -1e+30 }
 0x9c0   : > { %1581 = vmax.xlane.f32.xlu1 %v4806_v60  ;;  %v4816_v62 = vsel %vm780_vm2, %v1523_v58, -1e+30 }
 0x9c2   : > { %1575 = vmax.xlane.f32.xlu0 %v4811_v61 }
 0x9c4   : > { %1577 = vmax.xlane.f32.xlu1 %v4816_v62 }
 0x9e4   : > { %v3104_v1 = vpop.f32.mrb[32].mxu1 }
 0x9e5   : > { %v1914_v2 = vpop.f32.mrb[33].mxu1  ;;  %v4821_v3 = vsel %vm780_vm2, %v3104_v1, -1e+30 }
 0x9e6   : > { %v4825_v53 = vsel %vm780_vm2, %v1914_v2, -1e+30  ;;  %1997 = vmax.xlane.f32.xlu1 %v4821_v3  ;;  %v3105_v9 = vpop.f32.mrb[34].mxu1 }
 0x9e7   : > { %1993 = vmax.xlane.f32.xlu0 %v4825_v53  ;;  %v1917_v56 = vpop.f32.mrb[35].mxu1  ;;  %v4831_v10 = vsel %vm780_vm2, %v3105_v9, -1e+30 }
 0x9e8   : > { %v4836_v23 = vsel %vm780_vm2, %v1917_v56, -1e+30 }
 0x9ea   : > { %1999 = vmax.xlane.f32.xlu1 %v4831_v10 }
 0x9ec   : > { %v3108_v12 = vpop.f32.mrb[36].mxu1 }
 0x9ed   : > { %v1930_v4 = vpop.f32.mrb[37].mxu1  ;;  %v4841_v0 = vsel %vm780_vm2, %v3108_v12, -1e+30 }
 0x9ee   : > { %1995 = vmax.xlane.f32.xlu1 %v4836_v23  ;;  %v3109_v59 = vpop.f32.mrb[38].mxu1  ;;  %v4848_v15 = vsel %vm780_vm2, %v1930_v4, -1e+30 }
 0x9ef   : > { %v1933_v38 = vpop.f32.mrb[39].mxu1  ;;  %v4855_v18 = vsel %vm780_vm2, %v3109_v59, -1e+30 }
 0x9f0   : > { %v4868_v19 = vsel %vm780_vm2, %v1933_v38, -1e+30 }
 0x9f2   : > { %2005 = vmax.xlane.f32.xlu1 %v4841_v0 }
 0x9f4   : > { %v4844_v63 = vpop.f32.mrb[40].mxu1 }
 0x9f5   : > { %v1946_v13 = vpop.f32.mrb[41].mxu1 }
 0x9f6   : > { %2001 = vmax.xlane.f32.xlu1 %v4848_v15  ;;  %v3113_v5 = vpop.f32.mrb[42].mxu1 }
 0x9f7   : > { %v4851_v16 = vpop.f32.mrb[43].mxu1 }
 0x9fa   : > { %2007 = vmax.xlane.f32.xlu1 %v4855_v18 }
 0x9fc   : > { %v4858_v8 = vpop.f32.mrb[44].mxu1 }
 0x9fd   : > { %2133 = vrot.lane.b32.xlu0 %v4628_v46, %s3947_s17  ;;  %v4862_v11 = vpop.f32.mrb[45].mxu1  ;;  %v4877_v46 = vsel %vm780_vm2, %v1946_v13, -1e+30 }
 0x9fe   : > { %v3117_v17 = vpop.f32.mrb[46].mxu1 }
 0x9ff   : > { %v1965_v7 = vpop.f32.mrb[47].mxu1 }
 0xa00   : > { %v4895_v44 = vsel %vm780_vm2, %v1965_v7, -1e+30 }
 0xa0b   : > { %2131 = vrot.lane.b32.xlu1 %v4614_v6, %s3947_s17  ;;  %v4886_v6 = vsel %vm780_vm2, %v3113_v5, -1e+30 }
 0xa1c   : > { %2003 = vmax.xlane.f32.xlu0 %v4868_v19 }
 0xa2f   : > { %2009 = vmax.xlane.f32.xlu1 %v4877_v46 }
 0xa32   : > { %2135 = vrot.lane.b32.xlu0 %v4644_v35, %s3947_s17 }
 0xa33   : > { %v1556_v28 = vpop.xlane.xlu0 %1555  ;;  %2015 = vmax.xlane.f32.xlu1 %v4886_v6 }
 0xa34   : > { %v1585_v39 = vsub.f32 %v4741_v30, %v1556_v28  ;;  %v1552_v41 = vpop.xlane.xlu1 %1551  ;;  %v4902_v30 = vsel %vm780_vm2, %v3117_v17, -1e+30 }
 0xa35   : > { %v1583_v43 = vsub.f32 %v4746_v40, %v1552_v41 }
 0xa36   : > { %v1603_v50 = vmul.f32 1.442695, %v1585_v39 }
 0xa37   : > { %v1599_v51 = vmul.f32 1.442695, %v1583_v43  ;;  %v1554_v22 = vpop.xlane.xlu0 %1553  ;;  %2019 = vmax.xlane.f32.xlu1 %v4895_v44 }
 0xa38   : > { %v1584_v33 = vsub.f32 %v4751_v42, %v1554_v22  ;;  %v1558_v35 = vpop.xlane.xlu1 %1557  ;;  %3457 = vpow2.f32 %v1603_v50 }
 0xa39   : > { %v1586_v29 = vsub.f32 %v4756_v25, %v1558_v35  ;;  %3459 = vpow2.f32 %v1599_v51 }
 0xa3a   : > { %v1601_v40 = vmul.f32 1.442695, %v1584_v33 }
 0xa3b   : > { %v1605_v31 = vmul.f32 1.442695, %v1586_v29  ;;  %v1564_v55 = vpop.xlane.xlu0 %1563  ;;  %2023 = vmax.xlane.f32.xlu1 %v4902_v30 }
 0xa3c   : > { %3461 = vpow2.f32 %v1601_v40  ;;  %v1589_v42 = vsub.f32 %v4761_v49, %v1564_v55 }
 0xa3d   : > { %3463 = vpow2.f32 %v1605_v31  ;;  %v1566_v36 = vpop.xlane.xlu1 %1565  ;;  %v4927_v31 = vsel %vm780_vm2, %v4851_v16, -1e+30 }
 0xa3e   : > { %v1590_v37 = vsub.f32 %v4766_v52, %v1566_v36  ;;  %v1611_v12 = vmul.f32 1.442695, %v1589_v42 }
 0xa3f   : > { %v1560_v58 = vpop.xlane.xlu0 %1559 }
 0xa40   : > { %v1613_v25 = vmul.f32 1.442695, %v1590_v37  ;;  %v1587_v1 = vsub.f32 %v4771_v54, %v1560_v58 }
 0xa41   : > { %v1562_v2 = vpop.xlane.xlu1 %1561 }
 0xa42   : > { %v1607_v9 = vmul.f32 1.442695, %v1587_v1  ;;  %v1588_v56 = vsub.f32 %v4776_v21, %v1562_v2  ;;  %v4909_v59 = vpop.eup %3457  ;;  %3465 = vpow2.f32 %v1613_v25 }
 0xa43   : > { %v1572_v4 = vpop.xlane.xlu0 %1571  ;;  %v4911_v13 = vpop.eup %3459 }
 0xa44   : > { %v1609_v38 = vmul.f32 1.442695, %v1588_v56  ;;  %3467 = vpow2.f32 %v1607_v9  ;;  %v1593_v54 = vsub.f32 %v4781_v34, %v1572_v4 }
 0xa45   : > { %v1574_v52 = vpop.xlane.xlu1 %1573 }
 0xa46   : > { %v3462_v5 = vpop.eup %3461  ;;  %3469 = vpow2.f32 %v1609_v38  ;;  %v1594_v49 = vsub.f32 %v4786_v47, %v1574_v52  ;;  %v1619_v47 = vmul.f32 1.442695, %v1593_v54 }
 0xa47   : > { %v3464_v17 = vpop.eup %3463  ;;  %3471 = vpow2.f32 %v1611_v12  ;;  %v1568_v7 = vpop.xlane.xlu0 %1567  ;;  %v1663_v21 = vpack.c.bf16 %v3462_v5, %v4911_v13 }
 0xa48   : > { %v1621_v28 = vmul.f32 1.442695, %v1594_v49  ;;  %v1591_v39 = vsub.f32 %v4791_v45, %v1568_v7  ;;  %1637 = vadd.xlane.f32.xlu1 %v3464_v17  ;;  %v1664_v41 = vpack.c.bf16 %v3464_v17, %v4909_v59 }
 0xa49   : > { %3070 = vmatprep.mubr.bf16.mxu0 %v1663_v21  ;;  %v1570_v43 = vpop.xlane.xlu1 %1569 }
 0xa4a   : > { %v1615_v50 = vmul.f32 1.442695, %v1591_v39  ;;  %v1592_v51 = vsub.f32 %v4796_v32, %v1570_v43  ;;  %3071 = vmatmul.mubr.bf16.vlgmr.msra.gmra.mrb[40].mxu0 %v1664_v41  ;;  %3473 = vpow2.f32 %v1621_v28 }
 0xa4b   : > { %3119 = vmatpush3.bf16.msra.mxu0 %v4726_v14  ;;  %v1580_v22 = vpop.xlane.xlu0 %1579 }
 0xa4c   : > { %v1617_v34 = vmul.f32 1.442695, %v1592_v51  ;;  %3120 = vmatprep.subr.bf16.mxu0 %v4882_v27  ;;  %1633 = vadd.xlane.f32.xlu1 %v3462_v5  ;;  %3475 = vpow2.f32 %v1615_v50  ;;  %v3466_v33 = vpop.eup %3465  ;;  %v1597_v32 = vsub.f32 %v4801_v57, %v1580_v22 }
 0xa4d   : > { %v1582_v45 = vpop.xlane.xlu1 %1581 }
 0xa4e   : > { %3477 = vpow2.f32 %v1617_v34  ;;  %v1598_v35 = vsub.f32 %v4806_v60, %v1582_v45  ;;  %v3468_v29 = vpop.eup %3467  ;;  %v1627_v25 = vmul.f32 1.442695, %v1597_v32 }
 0xa4f   : > { %3479 = vpow2.f32 %v1619_v47  ;;  %3121 = vmatpush3.bf16.msra.mxu0 %v4882_v27  ;;  %v1576_v40 = vpop.xlane.xlu0 %1575 }
 0xa50   : > { %v3470_v14 = vpop.eup %3469  ;;  %v1629_v55 = vmul.f32 1.442695, %v1598_v35  ;;  %v1595_v36 = vsub.f32 %v4811_v61, %v1576_v40  ;;  %3122 = vmatprep.subr.bf16.mxu0 %v4871_v20  ;;  %v4940_v61 = vsel %vm780_vm2, %v4844_v63, -1e+30  ;;  %v4948_v63 = vsel %vm780_vm2, %v4862_v11, -1e+30 }
 0xa51   : > { %v4931_v37 = vpop.eup %3471  ;;  %2011 = vmax.xlane.f32.xlu0 %v4927_v31  ;;  %1641 = vadd.xlane.f32.xlu1 %v3470_v14  ;;  %v1578_v57 = vpop.xlane.xlu1 %1577  ;;  %v1665_v60 = vpack.c.bf16 %v3470_v14, %v3468_v29 }
 0xa52   : > { %v1623_v27 = vmul.f32 1.442695, %v1595_v36  ;;  %v1596_v42 = vsub.f32 %v4816_v62, %v1578_v57  ;;  %v1666_v58 = vpack.c.bf16 %v3466_v33, %v4931_v37  ;;  %3481 = vpow2.f32 %v1629_v55 }
 0xa53   : > { %3123 = vmatpush3.bf16.msra.mxu0 %v4871_v20  ;;  %3074 = vmatprep.mubr.bf16.mxu0 %v1665_v60 }
 0xa54   : > { %v1625_v16 = vmul.f32 1.442695, %v1596_v42  ;;  %3124 = vmatprep.subr.bf16.mxu0 %v4873_v24  ;;  %3075 = vmatmul.mubr.bf16.gmra.mrb[44].mxu0 %v1666_v58  ;;  %3483 = vpow2.f32 %v1623_v27  ;;  %v3474_v62 = vpop.eup %3473 }
 0xa55   : > { %2013 = vmax.xlane.f32.xlu0 %v4940_v61  ;;  %1645 = vadd.xlane.f32.xlu1 %v3466_v33 }
 0xa56   : > { %3485 = vpow2.f32 %v1625_v16  ;;  %v3476_v1 = vpop.eup %3475 }
 0xa57   : > { %3487 = vpow2.f32 %v1627_v25  ;;  %3125 = vmatpush3.bf16.msra.mxu0 %v4873_v24  ;;  %v4959_v24 = vsel %vm780_vm2, %v4858_v8, -1e+30 }
 0xa58   : > { %v3478_v20 = vpop.eup %3477  ;;  %3126 = vmatprep.subr.bf16.mxu0 %v4879_v26 }
 0xa59   : > { %v4951_v2 = vpop.eup %3479  ;;  %2017 = vmax.xlane.f32.xlu0 %v4948_v63  ;;  %1647 = vadd.xlane.f32.xlu1 %v3476_v1  ;;  %v1667_v9 = vpack.c.bf16 %v3478_v20, %v3476_v1 }
 0xa5a   : > { %v1668_v56 = vpack.c.bf16 %v3474_v62, %v4951_v2 }
 0xa5b   : > { %3127 = vmatpush3.bf16.msra.mxu0 %v4879_v26  ;;  %3078 = vmatprep.mubr.bf16.mxu0 %v1667_v9 }
 0xa5c   : > { %3079 = vmatmul.mubr.bf16.gmra.mrb[48].mxu0 %v1668_v56  ;;  %v4962_v11 = vpop.eup %3481 }
 0xa5d   : > { %2021 = vmax.xlane.f32.xlu0 %v4959_v24  ;;  %1649 = vadd.xlane.f32.xlu1 %v3478_v20 }
 0xa5e   : > { %v3484_v12 = vpop.eup %3483 }
 0xa60   : > { %v3486_v4 = vpop.eup %3485 }
 0xa61   : > { %v4964_v38 = vpop.eup %3487  ;;  %1635 = vadd.xlane.f32.xlu0 %v4909_v59  ;;  %1653 = vadd.xlane.f32.xlu1 %v3474_v62  ;;  %v1669_v26 = vpack.c.bf16 %v3486_v4, %v3484_v12 }
 0xa62   : > { %v1670_v52 = vpack.c.bf16 %v4962_v11, %v4964_v38 }
 0xa63   : > { %3082 = vmatprep.mubr.bf16.mxu0 %v1669_v26 }
 0xa64   : > { %3083 = vmatmul.mubr.bf16.gmra.mrb[52].mxu0 %v1670_v52 }
 0xa65   : > { %1631 = vadd.xlane.f32.xlu0 %v4911_v13 }
 0xa69   : > { %1639 = vadd.xlane.f32.xlu0 %v3468_v29 }
 0xa73   : > { %v1998_v48 = vpop.xlane.xlu1 %1997 }
 0xa74   : > { %v2027_v8 = vsub.f32 %v4821_v3, %v1998_v48  ;;  %v1994_v5 = vpop.xlane.xlu0 %1993 }
 0xa75   : > { %v2025_v49 = vsub.f32 %v4825_v53, %v1994_v5 }
 0xa76   : > { %v2045_v17 = vmul.f32 1.442695, %v2027_v8 }
 0xa77   : > { %v2041_v54 = vmul.f32 1.442695, %v2025_v49  ;;  %v2000_v7 = vpop.xlane.xlu1 %1999 }
 0xa78   : > { %3489 = vpow2.f32 %v2045_v17  ;;  %v2028_v59 = vsub.f32 %v4831_v10, %v2000_v7 }
 0xa79   : > { %3491 = vpow2.f32 %v2041_v54 }
 0xa7a   : > { %v2047_v21 = vmul.f32 1.442695, %v2028_v59 }
 0xa7b   : > { %v1996_v28 = vpop.xlane.xlu1 %1995 }
 0xa7c   : > { %3493 = vpow2.f32 %v2047_v21  ;;  %v2026_v39 = vsub.f32 %v4836_v23, %v1996_v28 }
 0xa7e   : > { %v2043_v13 = vmul.f32 1.442695, %v2026_v39 }
 0xa7f   : > { %v2006_v41 = vpop.xlane.xlu1 %2005 }
 0xa80   : > { %3495 = vpow2.f32 %v2043_v13  ;;  %v2031_v3 = vsub.f32 %v4841_v0, %v2006_v41 }
 0xa82   : > { %v3490_v43 = vpop.eup %3489  ;;  %v2053_v50 = vmul.f32 1.442695, %v2031_v3 }
 0xa83   : > { %2077 = vadd.xlane.f32.xlu0 %v3490_v43  ;;  %v2002_v53 = vpop.xlane.xlu1 %2001  ;;  %v3492_v47 = vpop.eup %3491 }
 0xa84   : > { %v2029_v51 = vsub.f32 %v4848_v15, %v2002_v53  ;;  %3497 = vpow2.f32 %v2053_v50  ;;  %v2134_v15 = vpop.permute.xlu0 %2133 }
 0xa86   : > { %v3494_v22 = vpop.eup %3493  ;;  %v2049_v10 = vmul.f32 1.442695, %v2029_v51 }
 0xa87   : > { %2073 = vadd.xlane.f32.xlu0 %v3492_v47  ;;  %2079 = vadd.xlane.f32.xlu1 %v3494_v22  ;;  %v2008_v34 = vpop.xlane.xlu1 %2007 }
 0xa88   : > { %v2032_v23 = vsub.f32 %v4855_v18, %v2008_v34  ;;  %3499 = vpow2.f32 %v2049_v10 }
 0xa8a   : > { %v3496_v45 = vpop.eup %3495  ;;  %v2055_v33 = vmul.f32 1.442695, %v2032_v23 }
 0xa8b   : > { %1643 = vadd.xlane.f32.xlu0 %v4931_v37  ;;  %2075 = vadd.xlane.f32.xlu1 %v3496_v45  ;;  %v2132_v0 = vpop.permute.xlu1 %2131  ;;  %v2105_v35 = vpack.c.bf16 %v3496_v45, %v3492_v47  ;;  %v2106_v37 = vpack.c.bf16 %v3494_v22, %v3490_v43 }
 0xa8c   : > { %3501 = vpow2.f32 %v2055_v33  ;;  %3128 = vmatprep.subr.bf16.mxu0 %v2132_v0 }
 0xa8d   : > { %3129 = vmatpush3.bf16.msra.mxu0 %v2132_v0  ;;  %3134 = vmatprep.mubr.bf16.mxu0 %v2105_v35 }
 0xa8e   : > { %3130 = vmatprep.subr.bf16.mxu0 %v2134_v15  ;;  %v3498_v29 = vpop.eup %3497 }
 0xa8f   : > { %1651 = vadd.xlane.f32.xlu0 %v4951_v2  ;;  %1655 = vadd.xlane.f32.xlu1 %v3484_v12 }
 0xa91   : > { %3131 = vmatpush3.bf16.msra.mxu0 %v2134_v15 }
 0xa92   : > { %v3500_v18 = vpop.eup %3499 }
 0xa93   : > { %1657 = vadd.xlane.f32.xlu1 %v3486_v4  ;;  %2085 = vadd.xlane.f32.xlu0 %v3498_v29 }
 0xa96   : > { %v3502_v32 = vpop.eup %3501 }
 0xa97   : > { %2081 = vadd.xlane.f32.xlu0 %v3500_v18  ;;  %2087 = vadd.xlane.f32.xlu1 %v3502_v32  ;;  %v2108_v27 = vpack.c.bf16 %v3502_v32, %v3498_v29 }
 0xaa9   : > { %v2004_v40 = vpop.xlane.xlu0 %2003 }
 0xaaa   : > { %v2030_v14 = vsub.f32 %v4868_v19, %v2004_v40 }
 0xaac   : > { %v2051_v55 = vmul.f32 1.442695, %v2030_v14 }
 0xaad   : > { %v2136_v36 = vpop.permute.xlu0 %2135 }
 0xaae   : > { %3503 = vpow2.f32 %v2051_v55  ;;  %3132 = vmatprep.subr.bf16.mxu0 %v2136_v36 }
 0xaaf   : > { %3133 = vmatpush3.bf16.msra.mxu0 %v2136_v36 }
 0xab2   : > { %3135 = vmatmul.mubr.bf16.vlgmr.msra.gmra.mrb[56].mxu0 %v2106_v37 }
 0xab8   : > { %v3504_v57 = vpop.eup %3503 }
 0xab9   : > { %2083 = vadd.xlane.f32.xlu1 %v3504_v57  ;;  %v2107_v60 = vpack.c.bf16 %v3504_v57, %v3500_v18 }
 0xabb   : > { %3138 = vmatprep.mubr.bf16.mxu0 %v2107_v60 }
 0xabc   : > { %3139 = vmatmul.mubr.bf16.gmra.mrb[60].mxu0 %v2108_v27  ;;  %v2010_v42 = vpop.xlane.xlu1 %2009 }
 0xabd   : > { %v2033_v1 = vsub.f32 %v4877_v46, %v2010_v42 }
 0xabf   : > { %v2057_v2 = vmul.f32 1.442695, %v2033_v1 }
 0xac0   : > { %v2016_v58 = vpop.xlane.xlu1 %2015 }
 0xac1   : > { %v2036_v25 = vsub.f32 %v4886_v6, %v2016_v58 }
 0xac3   : > { %v2063_v16 = vmul.f32 1.442695, %v2036_v25 }
 0xac4   : > { %v2020_v62 = vpop.xlane.xlu1 %2019 }
 0xac5   : > { %3505 = vpow2.f32 %v2063_v16  ;;  %v2038_v26 = vsub.f32 %v4895_v44, %v2020_v62 }
 0xac6   : > { %3507 = vpow2.f32 %v2057_v2 }
 0xac7   : > { %v2067_v5 = vmul.f32 1.442695, %v2038_v26 }
 0xac8   : > { %v2024_v20 = vpop.xlane.xlu1 %2023 }
 0xac9   : > { %v2040_v9 = vsub.f32 %v4902_v30, %v2024_v20 }
 0xacb   : > { %v2071_v52 = vmul.f32 1.442695, %v2040_v9 }
 0xacf   : > { %v3506_v19 = vpop.eup %3505 }
 0xad0   : > { %2095 = vadd.xlane.f32.xlu1 %v3506_v19  ;;  %v3508_v54 = vpop.eup %3507 }
 0xad5   : > { %v1638_v39 = vpop.xlane.xlu1 %1637 }
 0xad9   : > { %v1634_v3 = vpop.xlane.xlu1 %1633 }
 0xade   : > { %v2012_v56 = vpop.xlane.xlu0 %2011  ;;  %v1642_v53 = vpop.xlane.xlu1 %1641 }
 0xadf   : > { %v2034_v12 = vsub.f32 %v4927_v31, %v2012_v56 }
 0xae1   : > { %v2059_v4 = vmul.f32 1.442695, %v2034_v12 }
 0xae2   : > { %v2014_v6 = vpop.xlane.xlu0 %2013  ;;  %v1646_v51 = vpop.xlane.xlu1 %1645 }
 0xae3   : > { %3509 = vpow2.f32 %v2059_v4  ;;  %v2035_v48 = vsub.f32 %v4940_v61, %v2014_v6 }
 0xae4   : > { %3511 = vpow2.f32 %v2071_v52 }
 0xae5   : > { %v2061_v8 = vmul.f32 1.442695, %v2035_v48 }
 0xae6   : > { %v2018_v46 = vpop.xlane.xlu0 %2017  ;;  %v1648_v22 = vpop.xlane.xlu1 %1647 }
 0xae7   : > { %3513 = vpow2.f32 %v2061_v8  ;;  %v2037_v49 = vsub.f32 %v4948_v63, %v2018_v46 }
 0xae8   : > { %3515 = vpow2.f32 %v2067_v5 }
 0xae9   : > { %v2065_v30 = vmul.f32 1.442695, %v2037_v49 }
 0xaea   : > { %v2022_v17 = vpop.xlane.xlu0 %2021  ;;  %v1650_v23 = vpop.xlane.xlu1 %1649 }
 0xaeb   : > { %3517 = vpow2.f32 %v2065_v30  ;;  %v2039_v31 = vsub.f32 %v4959_v24, %v2022_v17 }
 0xaed   : > { %v3510_v44 = vpop.eup %3509  ;;  %v2069_v7 = vmul.f32 1.442695, %v2039_v31 }
 0xaee   : > { %2091 = vadd.xlane.f32.xlu1 %v3510_v44  ;;  %v2109_v59 = vpack.c.bf16 %v3510_v44, %v3508_v54  ;;  %v3512_v61 = vpop.eup %3511  ;;  %v1636_v50 = vpop.xlane.xlu0 %1635 }
 0xaef   : > { %3519 = vpow2.f32 %v2069_v7  ;;  %v1654_v33 = vpop.xlane.xlu1 %1653 }
 0xaf0   : > { %3142 = vmatprep.mubr.bf16.mxu0 %v2109_v59  ;;  %3521 = vrcp.f32 %v1636_v50 }
 0xaf1   : > { %v3514_v21 = vpop.eup %3513 }
 0xaf2   : > { %2093 = vadd.xlane.f32.xlu0 %v3514_v21  ;;  %2103 = vadd.xlane.f32.xlu1 %v3512_v61  ;;  %v2110_v28 = vpack.c.bf16 %v3506_v19, %v3514_v21  ;;  %v3516_v63 = vpop.eup %3515  ;;  %v1632_v47 = vpop.xlane.xlu0 %1631 }
 0xaf3   : > { %3523 = vrcp.f32 %v1632_v47 }
 0xaf4   : > { %3143 = vmatmul.mubr.bf16.gmra.mrb[64].mxu0 %v2110_v28  ;;  %3525 = vrcp.f32 %v1638_v39 }
 0xaf5   : > { %v3518_v13 = vpop.eup %3517  ;;  %3527 = vrcp.f32 %v1634_v3 }
 0xaf6   : > { %2089 = vadd.xlane.f32.xlu0 %v3508_v54  ;;  %2099 = vadd.xlane.f32.xlu1 %v3516_v63  ;;  %v2111_v41 = vpack.c.bf16 %v3516_v63, %v3518_v13  ;;  %v1640_v10 = vpop.xlane.xlu0 %1639 }
 0xaf8   : > { %3146 = vmatprep.mubr.bf16.mxu0 %v2111_v41 }
 0xaf9   : > { %v3520_v24 = vpop.eup %3519 }
 0xafa   : > { %2101 = vadd.xlane.f32.xlu0 %v3520_v24  ;;  %v2112_v43 = vpack.c.bf16 %v3512_v61, %v3520_v24  ;;  %v3522_v15 = vpop.eup %3521 }
 0xafc   : > { %3147 = vmatmul.mubr.bf16.gmra.mrb[68].mxu0 %v2112_v43 }
 0xafd   : > { %v3524_v18 = vpop.eup %3523 }
 0xafe   : > { %2097 = vadd.xlane.f32.xlu0 %v3518_v13  ;;  %v3526_v14 = vpop.eup %3525 }
 0xaff   : > { %v3528_v37 = vpop.eup %3527 }
 0xb10   : > { %v4988_v34 = vpop.xlane.xlu0 %2077 }
 0xb14   : > { %v4990_v45 = vpop.xlane.xlu0 %2073  ;;  %v2080_v35 = vpop.xlane.xlu1 %2079 }
 0xb18   : > { %v1644_v0 = vpop.xlane.xlu0 %1643  ;;  %v2076_v27 = vpop.xlane.xlu1 %2075 }
 0xb19   : > { %3529 = vrcp.f32 %v1644_v0 }
 0xb1a   : > { %3531 = vrcp.f32 %v1640_v10 }
 0xb1b   : > { %3533 = vrcp.f32 %v1646_v51 }
 0xb1c   : > { %3535 = vrcp.f32 %v1642_v53  ;;  %v1652_v58 = vpop.xlane.xlu0 %1651  ;;  %v1656_v16 = vpop.xlane.xlu1 %1655 }
 0xb1d   : > { %v3072_v29 = vpop.f32.mrb[40].mxu0  ;;  %3537 = vrcp.f32 %v1652_v58 }
 0xb1e   : > { %v4992_v32 = vmul.f32 %v3522_v15, %v3072_v29  ;;  %v1705_v40 = vpop.f32.mrb[41].mxu0  ;;  %3539 = vrcp.f32 %v1648_v22 }
 0xb1f   : > { %v4994_v55 = vmul.f32 %v3524_v18, %v1705_v40  ;;  %v3073_v36 = vpop.f32.mrb[42].mxu0  ;;  %3541 = vrcp.f32 %v1654_v33 }
 0xb20   : > { %v4996_v57 = vmul.f32 %v3526_v14, %v3073_v36  ;;  %v1708_v60 = vpop.f32.mrb[43].mxu0  ;;  %3543 = vrcp.f32 %v1650_v23  ;;  %v1658_v6 = vpop.xlane.xlu1 %1657 }
 0xb21   : > { %v4998_v42 = vmul.f32 %v3528_v37, %v1708_v60  ;;  %3545 = vrcp.f32 %v1656_v16  ;;  %v2086_v3 = vpop.xlane.xlu0 %2085 }
 0xb22   : > { %3547 = vrcp.f32 %v1658_v6 }
 0xb23   : > { %v3530_v25 = vpop.eup %3529  ;;  %3549 = vrcp.f32 %v4988_v34 }
 0xb24   : > { %v3532_v62 = vpop.eup %3531  ;;  %3551 = vrcp.f32 %v4990_v45  ;;  %v2088_v43 = vpop.xlane.xlu1 %2087 }
 0xb25   : > { %v3534_v2 = vpop.eup %3533  ;;  %3553 = vrcp.f32 %v2080_v35  ;;  %v2082_v53 = vpop.xlane.xlu0 %2081 }
 0xb26   : > { %v3536_v12 = vpop.eup %3535  ;;  %3555 = vrcp.f32 %v2076_v27 }
 0xb27   : > { %v3076_v19 = vpop.f32.mrb[44].mxu0  ;;  %v3538_v48 = vpop.eup %3537  ;;  %3557 = vrcp.f32 %v2086_v3 }
 0xb28   : > { %v5000_v1 = vmul.f32 %v3530_v25, %v3076_v19  ;;  %v1721_v20 = vpop.f32.mrb[45].mxu0  ;;  %v3540_v5 = vpop.eup %3539  ;;  %3559 = vrcp.f32 %v2082_v53 }
 0xb29   : > { %v5002_v9 = vmul.f32 %v3532_v62, %v1721_v20  ;;  %v3077_v56 = vpop.f32.mrb[46].mxu0  ;;  %v3542_v30 = vpop.eup %3541  ;;  %3561 = vrcp.f32 %v2088_v43 }
 0xb2a   : > { %v5004_v4 = vmul.f32 %v3534_v2, %v3077_v56  ;;  %v1724_v26 = vpop.f32.mrb[47].mxu0  ;;  %v3544_v54 = vpop.eup %3543 }
 0xb2b   : > { %v5006_v52 = vmul.f32 %v3536_v12, %v1724_v26  ;;  %v3546_v21 = vpop.eup %3545 }
 0xb2c   : > { %v3548_v13 = vpop.eup %3547 }
 0xb2d   : > { %v3550_v50 = vpop.eup %3549 }
 0xb2e   : > { %v3552_v22 = vpop.eup %3551 }
 0xb2f   : > { %v3080_v8 = vpop.f32.mrb[48].mxu0  ;;  %v3554_v23 = vpop.eup %3553 }
 0xb30   : > { %v5008_v46 = vmul.f32 %v3538_v48, %v3080_v8  ;;  %v1737_v49 = vpop.f32.mrb[49].mxu0  ;;  %v3556_v0 = vpop.eup %3555 }
 0xb31   : > { %v5010_v17 = vmul.f32 %v3540_v5, %v1737_v49  ;;  %v3081_v31 = vpop.f32.mrb[50].mxu0  ;;  %v3558_v14 = vpop.eup %3557 }
 0xb32   : > { %v5012_v44 = vmul.f32 %v3542_v30, %v3081_v31  ;;  %v1740_v7 = vpop.f32.mrb[51].mxu0  ;;  %v3560_v37 = vpop.eup %3559 }
 0xb33   : > { %v5014_v59 = vmul.f32 %v3544_v54, %v1740_v7  ;;  %v3562_v27 = vpop.eup %3561 }
 0xb37   : > { %v5016_v61 = vpop.f32.mrb[52].mxu0 }
 0xb38   : > { %v1753_v28 = vpop.f32.mrb[53].mxu0 }
 0xb39   : > { %v5018_v39 = vmul.f32 %v3546_v21, %v1753_v28  ;;  %v5020_v63 = vpop.f32.mrb[54].mxu0 }
 0xb3a   : > { %v1756_v41 = vpop.f32.mrb[55].mxu0 }
 0xb3b   : > { %v5022_v24 = vmul.f32 %v3548_v13, %v1756_v41 }
 0xb46   : > { %v2084_v51 = vpop.xlane.xlu1 %2083 }
 0xb47   : > { %3563 = vrcp.f32 %v2084_v51 }
 0xb51   : > { %v3564_v25 = vpop.eup %3563 }
 0xb5d   : > { %v2096_v26 = vpop.xlane.xlu1 %2095 }
 0xb5e   : > { %3565 = vrcp.f32 %v2096_v26 }
 0xb68   : > { %v3566_v54 = vpop.eup %3565 }
 0xb7b   : > { %v2092_v48 = vpop.xlane.xlu1 %2091 }
 0xb7c   : > { %3567 = vrcp.f32 %v2092_v48 }
 0xb7f   : > { %v2094_v6 = vpop.xlane.xlu0 %2093  ;;  %v2104_v5 = vpop.xlane.xlu1 %2103 }
 0xb80   : > { %3569 = vrcp.f32 %v2094_v6 }
 0xb83   : > { %v2090_v8 = vpop.xlane.xlu0 %2089  ;;  %v2100_v30 = vpop.xlane.xlu1 %2099 }
 0xb84   : > { %3571 = vrcp.f32 %v2090_v8 }
 0xb85   : > { %v3136_v47 = vpop.f32.mrb[56].mxu0  ;;  %3573 = vrcp.f32 %v2104_v5 }
 0xb86   : > { %v2179_v10 = vpop.f32.mrb[57].mxu0  ;;  %v2260_v34 = vmul.f32 %v3550_v50, %v3136_v47  ;;  %3575 = vrcp.f32 %v2100_v30  ;;  %v3568_v21 = vpop.eup %3567 }
 0xb87   : > { %v3137_v33 = vpop.f32.mrb[58].mxu0  ;;  %v2258_v35 = vmul.f32 %v3552_v22, %v2179_v10  ;;  %v2102_v49 = vpop.xlane.xlu0 %2101 }
 0xb88   : > { %v2261_v15 = vmul.f32 %v3554_v23, %v3137_v33  ;;  %v2182_v45 = vpop.f32.mrb[59].mxu0  ;;  %3577 = vrcp.f32 %v2102_v49  ;;  %v2372_v23 = vld [vmem:[#allocation16 + $0x10] sm:$0xff] }
 0xb89   : > { %v2259_v29 = vmul.f32 %v3556_v0, %v2182_v45 }
 0xb8a   : > { %v3385_v18 = vpack.i.bf16 %v2261_v15, %v2260_v34  ;;  %v3570_v28 = vpop.eup %3569 }
 0xb8b   : > { %v3390_v40 = vpack.i.bf16 %v2259_v29, %v2258_v35  ;;  %v2098_v31 = vpop.xlane.xlu0 %2097 }
 0xb8c   : > { %3386 = vrot.lane.b32.xlu1 %v3385_v18, %s3946_s16  ;;  %3579 = vrcp.f32 %v2098_v31 }
 0xb8d   : > { %3391 = vrot.lane.b32.xlu0 %v3390_v40, %s3946_s16 }
 0xb8e   : > { %v3572_v41 = vpop.eup %3571 }
 0xb8f   : > { %v3140_v36 = vpop.f32.mrb[60].mxu0  ;;  %v3574_v22 = vpop.eup %3573 }
 0xb90   : > { %v2195_v60 = vpop.f32.mrb[61].mxu0  ;;  %v2264_v16 = vmul.f32 %v3558_v14, %v3140_v36  ;;  %v3576_v33 = vpop.eup %3575  ;;  %v2374_v36 = vld [vmem:[#allocation16 + $0x20] sm:$0xff] }
 0xb91   : > { %v3141_v58 = vpop.f32.mrb[62].mxu0  ;;  %v2262_v20 = vmul.f32 %v3560_v37, %v2195_v60 }
 0xb92   : > { %v2265_v19 = vmul.f32 %v3562_v27, %v3141_v58  ;;  %v2198_v62 = vpop.f32.mrb[63].mxu0  ;;  %v3578_v34 = vpop.eup %3577  ;;  %v2376_v27 = vld [vmem:[#allocation16 + $0x30] sm:$0xff]  ;;  %v2370_v58 = vld [vmem:[#allocation16] sm:$0xff] }
 0xb93   : > { %v2263_v2 = vmul.f32 %v3564_v25, %v2198_v62  ;;  %v2371_v25 = vld [vmem:[#allocation16 + $0x8] sm:$0xff]  ;;  %v3437_v62 = vld [vmem:[#allocation14] sm:$0xff]  }
 0xb94   : > { %v3395_v56 = vpack.i.bf16 %v2265_v19, %v2264_v16  ;;  %v2373_v16 = vld [vmem:[#allocation16 + $0x18] sm:$0xff]  ;;  %v2375_v19 = vld [vmem:[#allocation16 + $0x28] sm:$0xff]  ;;  %3166 = vmatprep.mubr.msk.bf16.mxu0 %vm502_vm0, %v3437_v62 }
 0xb95   : > { %v3400_v12 = vpack.i.bf16 %v2263_v2, %v2262_v20  ;;  %v2377_v20 = vld [vmem:[#allocation16 + $0x38] sm:$0xff] }
 0xb96   : > { %3396 = vrot.lane.b32.xlu1 %v3395_v56, %s3946_s16  ;;  %v3580_v45 = vpop.eup %3579 }
 0xb97   : > { %3401 = vrot.lane.b32.xlu0 %v3400_v12, %s3946_s16 }
 0xbb6   : > { %1659 = vadd.xlane.f32.xlu0 %v4964_v38 }
 0xbba   : > { %1661 = vadd.xlane.f32.xlu1 %v4962_v11 }
 0xbc7   : > { %v3144_v7 = vpop.f32.mrb[64].mxu0 }
 0xbc8   : > { %v2211_v38 = vpop.f32.mrb[65].mxu0  ;;  %v2268_v11 = vmul.f32 %v3570_v28, %v3144_v7 }
 0xbc9   : > { %v3145_v13 = vpop.f32.mrb[66].mxu0  ;;  %v2266_v53 = vmul.f32 %v3572_v41, %v2211_v38 }
 0xbca   : > { %v2269_v3 = vmul.f32 %v3566_v54, %v3145_v13  ;;  %v2214_v43 = vpop.f32.mrb[67].mxu0 }
 0xbcb   : > { %v2267_v50 = vmul.f32 %v3568_v21, %v2214_v43 }
 0xbcc   : > { %v3410_v51 = vpack.i.bf16 %v2269_v3, %v2268_v11 }
 0xbcd   : > { %v3405_v47 = vpack.i.bf16 %v2267_v50, %v2266_v53 }
 0xbce   : > { %3411 = vrot.lane.b32.xlu1 %v3410_v51, %s3946_s16 }
 0xbcf   : > { %v3148_v10 = vpop.f32.mrb[68].mxu0  ;;  %3406 = vrot.lane.b32.xlu0 %v3405_v47, %s3946_s16 }
 0xbd0   : > { %v2227_v0 = vpop.f32.mrb[69].mxu0  ;;  %v2272_v35 = vmul.f32 %v3578_v34, %v3148_v10 }
 0xbd1   : > { %v3149_v15 = vpop.f32.mrb[70].mxu0  ;;  %v2270_v40 = vmul.f32 %v3580_v45, %v2227_v0 }
 0xbd2   : > { %v2273_v29 = vmul.f32 %v3574_v22, %v3149_v15  ;;  %v2230_v18 = vpop.f32.mrb[71].mxu0  ;;  %2390 = vperm.xlu1 %3384, %v2372_v23  }
 0xbd3   : > { %v2271_v14 = vmul.f32 %v3576_v33, %v2230_v18 }
 0xbd4   : > { %v3420_v37 = vpack.i.bf16 %v2273_v29, %v2272_v35 }
 0xbd5   : > { %v3415_v60 = vpack.i.bf16 %v2271_v14, %v2270_v40 }
 0xbd6   : > { %2400 = vperm.xlu1 %3384, %v2374_v36  }
 0xbd7   : > { %3416 = vrot.lane.b32.xlu0 %v3415_v60, %s3946_s16 }
 0xbda   : > { %2410 = vperm.xlu1 %3384, %v2376_v27  }
 0xbdb   : > { %3421 = vrot.lane.b32.xlu0 %v3420_v37, %s3946_s16 }
 0xbdf   : > { %2380 = vperm.xlu0 %3383, %v2370_v58  }
 0xbe3   : > { %2385 = vperm.xlu0 %3383, %v2371_v25  }
 0xbe7   : > { %2395 = vperm.xlu0 %3383, %v2373_v16  }
 0xbeb   : > { %2405 = vperm.xlu0 %3383, %v2375_v19  }
 0xbef   : > { %2415 = vperm.xlu0 %3383, %v2377_v20   ;;  %v3438_v20 = vld [vmem:[#allocation14 + $0x8] sm:$0xff]  }
 0xbfe   : > { %v3387_v2 = vpop.permute.xlu1 %3386 }
 0xbff   : > { %v3389_v56 = vunpack.i.h.bf16 %v3387_v2  ;;  %v3388_v12 = vunpack.i.l.bf16 %v3387_v2  ;;  %v3392_v26 = vpop.permute.xlu0 %3391  ;;  %v3440_v2 = vld [vmem:[#allocation14 + $0x18] sm:$0xff]  }
 0xc00   : > { %v3394_v6 = vunpack.i.h.bf16 %v3392_v26  ;;  %v3393_v48 = vunpack.i.l.bf16 %v3392_v26 }
 0xc01   : > { %v2341_v8 = vsel %vm600_vm1, %v4996_v57, %v3389_v56  ;;  %v2340_v5 = vsel %vm600_vm1, %v4992_v32, %v3388_v12 }
 0xc02   : > { %v2355_v49 = vpack.c.bf16 %v2341_v8, %v2340_v5  ;;  %v2339_v30 = vsel %vm600_vm1, %v4998_v42, %v3394_v6  ;;  %v2338_v31 = vsel %vm600_vm1, %v4994_v55, %v3393_v48 }
 0xc03   : > { %v2354_v54 = vpack.c.bf16 %v2339_v30, %v2338_v31 }
 0xc04   : > { %v2454_v53 = vsel %vm502_vm0, %v2355_v49, 0 }
 0xc05   : > { %3238 = vmatprep.subr.msk.bf16.mxu0 %vm502_vm0, %v2354_v54  ;;  %v2451_v7 = vsel %vm502_vm0, %v2354_v54, 0  ;;  %v3585_v54 = vld [vmem:[%s4333_s1 + $0x10] sm:$0xff] }
 0xc06   : > { %3151 = vmatpush3.bf16.xpose.msra.mxu0 %v2451_v7 }
 0xc07   : > { %3239 = vmatprep.subr.msk.bf16.mxu0 %vm502_vm0, %v2355_v49 }
 0xc08   : > { %v3397_v21 = vpop.permute.xlu1 %3396 }
 0xc09   : > { %v3399_v57 = vunpack.i.h.bf16 %v3397_v21  ;;  %v3398_v38 = vunpack.i.l.bf16 %v3397_v21  ;;  %v3402_v28 = vpop.permute.xlu0 %3401 }
 0xc0a   : > { %v3404_v32 = vunpack.i.h.bf16 %v3402_v28  ;;  %v3403_v13 = vunpack.i.l.bf16 %v3402_v28  ;;  %v3586_v28 = vld [vmem:[%s4333_s1] sm:$0xff] }
 0xc0b   : > { %v2345_v42 = vsel %vm600_vm1, %v5004_v4, %v3399_v57  ;;  %v2344_v55 = vsel %vm600_vm1, %v5000_v1, %v3398_v38 }
 0xc0c   : > { %v2357_v41 = vpack.c.bf16 %v2345_v42, %v2344_v55  ;;  %v2343_v11 = vsel %vm600_vm1, %v5006_v52, %v3404_v32  ;;  %v2342_v3 = vsel %vm600_vm1, %v5002_v9, %v3403_v13  ;;  %v3587_v42 = vld [vmem:[%s4333_s1 + $0x18] sm:$0xff] }
 0xc0d   : > { %v2356_v43 = vpack.c.bf16 %v2343_v11, %v2342_v3 }
 0xc0e   : > { %3153 = vmatpush3.bf16.xpose.msra.mxu0 %v2454_v53  ;;  %v2460_v1 = vsel %vm502_vm0, %v2357_v41, 0 }
 0xc0f   : > { %3240 = vmatprep.subr.msk.bf16.mxu0 %vm502_vm0, %v2356_v43  ;;  %v2457_v50 = vsel %vm502_vm0, %v2356_v43, 0 }
 0xc16   : > { %3155 = vmatpush3.bf16.xpose.msra.mxu0 %v2457_v50 }
 0xc17   : > { %3241 = vmatprep.subr.msk.bf16.mxu0 %vm502_vm0, %v2357_v41  ;;  %v3588_v41 = vld [vmem:[%s4333_s1 + $0x8] sm:$0xff] }
 0xc1e   : > { %3157 = vmatpush3.bf16.xpose.msra.mxu0 %v2460_v1 }
 0xc43   : > { %v1660_v4 = vpop.xlane.xlu0 %1659 }
 0xc44   : > { %3581 = vrcp.f32 %v1660_v4 }
 0xc47   : > { %v3407_v52 = vpop.permute.xlu0 %3406  ;;  %v1662_v51 = vpop.xlane.xlu1 %1661 }
 0xc48   : > { %v3409_v47 = vunpack.i.h.bf16 %v3407_v52  ;;  %v3408_v9 = vunpack.i.l.bf16 %v3407_v52  ;;  %3583 = vrcp.f32 %v1662_v51  ;;  %v3589_v51 = vld [vmem:[%s4333_s1 + $0x30] sm:$0xff] }
 0xc4a   : > { %v2347_v22 = vsel %vm600_vm1, %v5014_v59, %v3409_v47  ;;  %v2346_v10 = vsel %vm600_vm1, %v5010_v17, %v3408_v9 }
 0xc4b   : > { %v2358_v23 = vpack.c.bf16 %v2347_v22, %v2346_v10  ;;  %v3417_v33 = vpop.permute.xlu0 %3416  ;;  %v3412_v0 = vpop.permute.xlu1 %3411  ;;  %v3590_v10 = vld [vmem:[%s4333_s1 + $0x20] sm:$0xff] }
 0xc4c   : > { %v3419_v34 = vunpack.i.h.bf16 %v3417_v33  ;;  %v3418_v15 = vunpack.i.l.bf16 %v3417_v33  ;;  %v3414_v45 = vunpack.i.h.bf16 %v3412_v0  ;;  %v3413_v35 = vunpack.i.l.bf16 %v3412_v0  ;;  %v3591_v0 = vld [vmem:[%s4333_s1 + $0x38] sm:$0xff] }
 0xc4d   : > { %3242 = vmatprep.subr.msk.bf16.mxu0 %vm502_vm0, %v2358_v23  ;;  %v2463_v29 = vsel %vm502_vm0, %v2358_v23, 0 }
 0xc4e   : > { %v3582_v18 = vpop.eup %3581  ;;  %v2351_v40 = vsel %vm600_vm1, %v5022_v24, %v3419_v34  ;;  %v2350_v59 = vsel %vm600_vm1, %v5018_v39, %v3418_v15  ;;  %v2349_v17 = vsel %vm600_vm1, %v5012_v44, %v3414_v45  ;;  %v2348_v14 = vsel %vm600_vm1, %v5008_v46, %v3413_v35  ;;  %3159 = vmatpush3.bf16.xpose.msra.mxu0 %v2463_v29  ;;  %v3592_v15 = vld [vmem:[%s4333_s1 + $0x28] sm:$0xff] }
 0xc4f   : > { %v2360_v36 = vpack.c.bf16 %v2351_v40, %v2350_v59  ;;  %v2359_v37 = vpack.c.bf16 %v2349_v17, %v2348_v14  ;;  %v3422_v60 = vpop.permute.xlu0 %3421  ;;  %v1798_v27 = vmul.f32 %v3582_v18, %v5016_v61 }
 0xc50   : > { %v3423_v58 = vunpack.i.l.bf16 %v3422_v60  ;;  %v3424_v24 = vunpack.i.h.bf16 %v3422_v60 }
 0xc51   : > { %3243 = vmatprep.subr.msk.bf16.mxu0 %vm502_vm0, %v2359_v37  ;;  %v2466_v19 = vsel %vm502_vm0, %v2359_v37, 0  ;;  %v2469_v62 = vsel %vm502_vm0, %v2360_v36, 0  ;;  %v2391_v26 = vpop.permute.xlu1 %2390 }
 0xc52   : > { %v3584_v25 = vpop.eup %3583  ;;  %v2352_v39 = vsel %vm600_vm1, %v1798_v27, %v3423_v58 }
 0xc53   : > { %v1799_v16 = vmul.f32 %v3584_v25, %v5020_v63  ;;  %v3439_v63 = vld [vmem:[#allocation14 + $0x10] sm:$0xff]  }
 0xc55   : > { %v2353_v44 = vsel %vm600_vm1, %v1799_v16, %v3424_v24  ;;  %v2401_v49 = vpop.permute.xlu1 %2400 }
 0xc56   : > { %v2361_v46 = vpack.c.bf16 %v2353_v44, %v2352_v39  ;;  %3161 = vmatpush3.bf16.xpose.msra.mxu0 %v2466_v19 }
 0xc57   : > { %3244 = vmatprep.subr.msk.bf16.mxu0 %vm502_vm0, %v2360_v36 }
 0xc58   : > { %v2472_v61 = vsel %vm502_vm0, %v2361_v46, 0 }
 0xc59   : > { %v2411_v3 = vpop.permute.xlu1 %2410 }
 0xc5e   : > { %3163 = vmatpush3.bf16.xpose.msra.mxu0 %v2469_v62  ;;  %v2381_v56 = vpop.permute.xlu0 %2380 }
 0xc5f   : > { %3245 = vmatprep.subr.msk.bf16.mxu0 %vm502_vm0, %v2361_v46 }
 0xc62   : > { %v2386_v12 = vpop.permute.xlu0 %2385 }
 0xc66   : > { %3165 = vmatpush3.bf16.xpose.msra.mxu0 %v2472_v61  ;;  %v2396_v6 = vpop.permute.xlu0 %2395 }
 0xc6a   : > { %v2406_v38 = vpop.permute.xlu0 %2405 }
 0xc6d   : > { %3167 = vmatmul.mubr.msk.bf16.vlgmr.msra.gmra.mrb[72].mxu0 %vm502_vm0, %v3438_v20 }
 0xc6e   : > { %3170 = vmatprep.mubr.msk.bf16.mxu0 %vm502_vm0, %v3439_v63  ;;  %v2416_v1 = vpop.permute.xlu0 %2415 }
 0xc75   : > { %3171 = vmatmul.mubr.msk.bf16.gmra.mrb[76].mxu0 %vm502_vm0, %v3440_v2 }
 0xd40   : > { %v3168_v48 = vpop.f32.mrb[72].mxu0 }
 0xd41   : > { %v2517_v8 = vadd.f32 %v3168_v48, %v2391_v26  ;;  %v2508_v5 = vpop.f32.mrb[73].mxu0 }
 0xd42   : > { %v2509_v30 = vadd.f32 %v2508_v5, %v2381_v56  ;;  %v3169_v31 = vpop.f32.mrb[74].mxu0 }
 0xd43   : > { %v2541_v7 = vadd.f32 %v3585_v54, %v2517_v8  ;;  %v2520_v21 = vadd.f32 %v3169_v31, %v2396_v6  ;;  %v2511_v57 = vpop.f32.mrb[75].mxu0 }
 0xd44   : > { %v2539_v32 = vadd.f32 %v3586_v28, %v2509_v30  ;;  %v2512_v13 = vadd.f32 %v2511_v57, %v2386_v12 }
 0xd45   : > { %2549 = vst [vmem:[%s5092_s20 + $0x10] sm:$0xff] %v2541_v7  ;;  %v2542_v55 = vadd.f32 %v3587_v42, %v2520_v21 }
 0xd46   : > { %2547 = vst [vmem:[%s5092_s20] sm:$0xff] %v2539_v32  ;;  %v2540_v11 = vadd.f32 %v3588_v41, %v2512_v13 }
 0xd47   : > { %2550 = vst [vmem:[%s5092_s20 + $0x18] sm:$0xff] %v2542_v55 }
 0xd48   : > { %2548 = vst [vmem:[%s5092_s20 + $0x8] sm:$0xff] %v2540_v11  ;;  %v3172_v43 = vpop.f32.mrb[76].mxu0 }
 0xd49   : > { %v2533_v53 = vadd.f32 %v3172_v43, %v2411_v3  ;;  %v2524_v50 = vpop.f32.mrb[77].mxu0 }
 0xd4a   : > { %v2525_v4 = vadd.f32 %v2524_v50, %v2401_v49  ;;  %v3173_v52 = vpop.f32.mrb[78].mxu0 }
 0xd4b   : > { %v2545_v47 = vadd.f32 %v3589_v51, %v2533_v53  ;;  %v2536_v9 = vadd.f32 %v3173_v52, %v2416_v1  ;;  %v2527_v22 = vpop.f32.mrb[79].mxu0 }
 0xd4c   : > { %v2543_v23 = vadd.f32 %v3590_v10, %v2525_v4  ;;  %v2528_v33 = vadd.f32 %v2527_v22, %v2406_v38 }
 0xd4d   : > { %2553 = vst [vmem:[%s5092_s20 + $0x30] sm:$0xff] %v2545_v47  ;;  %v2546_v34 = vadd.f32 %v3591_v0, %v2536_v9 }
 0xd4e   : > { %2551 = vst [vmem:[%s5092_s20 + $0x20] sm:$0xff] %v2543_v23  ;;  %v2544_v45 = vadd.f32 %v3592_v15, %v2528_v33 }
 0xd4f   : > { %2554 = vst [vmem:[%s5092_s20 + $0x38] sm:$0xff] %v2546_v34 }
 0xd50   : > { %2552 = vst [vmem:[%s5092_s20 + $0x28] sm:$0xff] %v2544_v45 }
 0xd51   : > { %3860 = shalt.err (!%p3857_p10)
}
 0xd52   : > { %s3861_s1 = scalar_lea.hbm %s5111_s29, 1024  ;;  %s3865_s20 = scalar_lea.hbm %s5202_s23, 2048 }
 0xd53   : > { %p3862_p11 = scmp.ne.s32.totalorder %s5111_s29, %s3861_s1  ;;  %p3866_p7 = scmp.lt.u32.totalorder %s5111_s29, %s5202_s23 }
 0xd54   : > { %p3867_p6 = scmp.lt.u32.totalorder %s3865_s20, %s3861_s1  ;;  %p3869_p12 = scmp.lt.u32.totalorder %s3861_s1, %s5111_s29 }
 0xd55   : > { %p3863_p3 = pnand %p3862_p11, %p5203_p1 }
 0xd56   : > { %p3868_p9 = por %p3867_p6, %p3866_p7 }
 0xd57   : > { %p3864_p5 = pneg %p3863_p3 }
 0xd58   : > { %p3870_p13 = por %p3869_p12, %p3868_p9 }
 0xd5a   : > { %p3871_p0 = pnand %p3870_p13, %p3864_p5 }
 0xd5c   : > { %3874 = shalt.err (!%p3871_p0)
}
 0xd5d   : > { %s3949_s15 = smov 128   ;;  %s3950_s24 = smov 8  }
 0xd5e   : > { %3280 = dma.vmem_to_hbm [thread:$0]  (%p5203_p1), %s5103_s13, 1024, %s5111_s29, %s2556_s25, %s3949_s15, %s3949_s15, %s3950_s24  }
 0xd5f PF: > { %s2584_s22 = sand.u32 1, %s3917_s30   ;;  %p5204_p2 = scmp.ne.s32.totalorder %s5191_s14, 0 }
 0xd60   : > { %p5205_p8 = scmp.ge.s32.totalorder %s3929_s12, 2  ;;  %s2585_s19 = scalar_lea.sflag [#allocation4], %s2584_s22 }
 0xd62   : > { %p3312_p4 = pnand %p5205_p8, %p5204_p2 }
 0xd64   : > { %3912 = dma.done.wait (!%p3312_p4), %s2585_s19, 1024  }
 0xd65   : > { %3914 = vsyncadd (!%p3312_p4), %s2585_s19, 4294966272  ;;  %p26_p10 = scmp.ge.s32.totalorder %s4245_s27, 4   ;;  %s5206_s30 = smov %s3921_s10 }
 0xd66   : > { %s5207_s10 = smov %s3925_s11  ;;  %s5208_s11 = smov %s4256_s21 }
 0xd67   : > { %s5209_s12 = smov %s4245_s27  ;;  %28 = sbr.rel (!%p26_p10) target bundleno = 13 (0xd), region = 133 }
 0xd6e   :  { %2590 = vsyncpa [#allocation3], 1 }
 0xd6f   :  { %2592 = vsyncpa [#allocation3 + $0x1], 1 }
 0xd70   :  { %2593 = vsyncpa [#allocation6], 1 }
 0xd71   :  { %2594 = vsyncpa [#allocation9], 1 }
 0xd72   :  { %2595 = vsyncpa [#allocation12], 1 }
 0xd73   :  { %2596 = vsyncpa [#allocation15], 1 }
 0xd74   :  { %2597 = vsyncpa [#allocation4], 1 }
 0xd75   :  { %2599 = vsyncpa [#allocation4 + $0x1], 1 }

</bundles_post_ra>
